<compile_context>
chip_gen: v7x
topology: tpu7x:2x2x1
jax: 0.10.0
libtpu: 0.0.40
codegen_flags: <defaults>
</compile_context>

<pallas_src>
import functools

import jax
import jax.numpy as jnp
import numpy as np
from jax.experimental import pallas as pl
from jax.experimental.pallas import tpu as pltpu

LANE = 128


def _round_up(x, m):
    return ((x + m - 1) // m) * m


def _pad2d(x, rows, cols):
    return jnp.pad(x, ((0, rows - x.shape[0]), (0, cols - x.shape[1])))


def _vmem_limit(*block_nbytes):
    # Explicit scoped-VMEM budget: all blocks double-buffered + generous headroom,
    # never below the default scoped limits and kept under v7x's 64 MiB physical.
    need = 2 * sum(int(b) for b in block_nbytes) + 8 * 1024 * 1024
    return int(min(max(need, 32 * 1024 * 1024), 56 * 1024 * 1024))


# ---------------------------------------------------------------------------
# Kernels (all matmuls: compute-dtype inputs on the MXU, f32 accumulation)
# ---------------------------------------------------------------------------

def _xw_kernel(feat_ref, wb_ref, xw_ref):
    # XW_tile = feat_tile @ W_base   (hoisted out of the adj-streaming pass)
    xw_ref[...] = jnp.dot(feat_ref[...], wb_ref[...],
                          preferred_element_type=jnp.float32).astype(xw_ref.dtype)


def _hidden_kernel(adj_ref, xw_ref, hid_ref):
    # hidden_tile = adj_tile @ XW   (hp-wide contraction instead of fp-wide)
    hid_ref[...] = jnp.dot(adj_ref[...], xw_ref[...],
                           preferred_element_type=jnp.float32).astype(hid_ref.dtype)


def _z_kernel(adj_ref, hid_ref, wml_ref, noise_ref, z_ref):
    # One shared adj row-tile pass feeds both the mean and logstd heads
    # (concatenated weights), then relu/exp/reparam are fused in f32.
    t = jnp.dot(adj_ref[...], hid_ref[...], preferred_element_type=jnp.float32)
    ml = jnp.dot(t.astype(wml_ref.dtype), wml_ref[...],
                 preferred_element_type=jnp.float32)
    zp = z_ref.shape[-1]
    mean = jax.nn.relu(ml[:, :zp])
    logstd = jax.nn.relu(ml[:, zp:])
    z_ref[...] = (noise_ref[...] * jnp.exp(logstd) + mean).astype(z_ref.dtype)


def _xhat_logits_kernel(adj_ref, zfull_ref, zrow_ref, wb2_ref, xhat_ref, logits_ref):
    # x_hat_tile  = adj_tile @ (Z @ W_base2)  (reassociated: (adj_tile @ Z) @ W)
    # logits_tile = Z_row_tile @ Z^T          (NT dot_general; Z already resident)
    t = jnp.dot(adj_ref[...], zfull_ref[...], preferred_element_type=jnp.float32)
    xhat_ref[...] = jnp.dot(t.astype(wb2_ref.dtype), wb2_ref[...],
                            preferred_element_type=jnp.float32).astype(xhat_ref.dtype)
    logits_ref[...] = jax.lax.dot_general(
        zrow_ref[...], zfull_ref[...],
        dimension_numbers=(((1,), (1,)), ((), ())),
        preferred_element_type=jnp.float32).astype(logits_ref.dtype)


# ---------------------------------------------------------------------------
# Wrapper
# ---------------------------------------------------------------------------

@functools.partial(jax.jit, static_argnames=("block_rows", "compute_dtype"))
def vgae_forward(adj, features, w_base, w_mean, w_logstd, w_base2, noise,
                 *, block_rows=128, compute_dtype=jnp.bfloat16):
    n, f = features.shape
    h = w_base.shape[1]
    z = w_mean.shape[1]
    assert adj.shape == (n, n)
    assert w_mean.shape == (h, z) and w_logstd.shape == (h, z)
    assert w_base2.shape == (z, f)      # see TODO(synk) about gcn_base2
    assert noise.shape == (n, z)
    assert block_rows % LANE == 0, "block_rows must be a multiple of 128"

    tm = block_rows
    n_p = _round_up(n, tm)              # padded node count (tile & lane aligned)
    fp = _round_up(f, LANE)
    hp = _round_up(h, LANE)
    zp = _round_up(z, LANE)

    cd = compute_dtype
    f32 = jnp.float32
    esz = np.dtype(cd).itemsize

    # Zero padding keeps the math exact: padded feature/weight columns are zero
    # and padded noise rows/cols are zero, so padded Z rows/cols are exactly zero.
    # NOTE: in a training loop, cast adj to the compute dtype once outside the step.
    adj_c = _pad2d(adj, n_p, n_p).astype(cd)
    feat_c = _pad2d(features, n_p, fp).astype(cd)
    wb_c = _pad2d(w_base, fp, hp).astype(cd)
    wml_c = jnp.concatenate([_pad2d(w_mean, hp, zp),
                             _pad2d(w_logstd, hp, zp)], axis=1).astype(cd)  # (hp, 2zp)
    wb2_c = _pad2d(w_base2, zp, fp).astype(cd)
    noise_f = _pad2d(noise, n_p, zp).astype(f32)

    grid = (n_p // tm,)
    row = lambda d: pl.BlockSpec((tm, d), lambda i: (i, 0))
    full = lambda r, c: pl.BlockSpec((r, c), lambda i: (0, 0))
    adj_row = row(n_p)

    def params(*block_nbytes):
        return pltpu.CompilerParams(
            dimension_semantics=("parallel",),
            vmem_limit_bytes=_vmem_limit(*block_nbytes))

    # Pass 0: XW = features @ W_base (small, one row-tiled sweep; hoisted).
    xw = pl.pallas_call(
        _xw_kernel,
        out_shape=jax.ShapeDtypeStruct((n_p, hp), cd),
        grid=grid,
        in_specs=[row(fp), full(fp, hp)],
        out_specs=row(hp),
        compiler_params=params(tm * fp * esz, fp * hp * esz, tm * hp * esz),
        cost_estimate=pl.CostEstimate(
            flops=2 * n_p * fp * hp, transcendentals=0,
            bytes_accessed=esz * (n_p * fp + fp * hp + n_p * hp)),
    )(feat_c, wb_c)

    # Pass 1: hidden = adj @ XW
    hidden = pl.pallas_call(
        _hidden_kernel,
        out_shape=jax.ShapeDtypeStruct((n_p, hp), cd),
        grid=grid,
        in_specs=[adj_row, full(n_p, hp)],
        out_specs=row(hp),
        compiler_params=params(tm * n_p * esz, n_p * hp * esz, tm * hp * esz),
        cost_estimate=pl.CostEstimate(
            flops=2 * n_p * n_p * hp, transcendentals=0,
            bytes_accessed=esz * (n_p * n_p + 2 * n_p * hp)),
    )(adj_c, xw)

    # Pass 2: Z = noise * exp(relu((adj@hidden)@W_logstd)) + relu((adj@hidden)@W_mean)
    zmat = pl.pallas_call(
        _z_kernel,
        out_shape=jax.ShapeDtypeStruct((n_p, zp), cd),
        grid=grid,
        in_specs=[adj_row, full(n_p, hp), full(hp, 2 * zp), row(zp)],
        out_specs=row(zp),
        compiler_params=params(tm * n_p * esz, n_p * hp * esz, hp * 2 * zp * esz,
                               tm * zp * 4, tm * zp * esz),
        cost_estimate=pl.CostEstimate(
            flops=2 * n_p * n_p * hp + 2 * n_p * hp * 2 * zp,
            transcendentals=n_p * zp,
            bytes_accessed=esz * (n_p * n_p + n_p * hp + hp * 2 * zp + n_p * zp)
            + 4 * n_p * zp),
    )(adj_c, hidden, wml_c, noise_f)

    # Pass 3 (fused): x_hat = adj @ (Z @ W_base2)  and  adj_logits = Z @ Z.T.
    # Z is fully VMEM-resident here, so the (tm, N) logits row store is lane-dense
    # and replaces the former separate 128x128-tiled logits pass.
    xhat_p, logits_p = pl.pallas_call(
        _xhat_logits_kernel,
        out_shape=(jax.ShapeDtypeStruct((n_p, fp), f32),
                   jax.ShapeDtypeStruct((n_p, n_p), f32)),
        grid=grid,
        in_specs=[adj_row, full(n_p, zp), row(zp), full(zp, fp)],
        out_specs=(row(fp), row(n_p)),
        compiler_params=params(tm * n_p * esz, n_p * zp * esz, tm * zp * esz,
                               zp * fp * esz, tm * fp * 4, tm * n_p * 4),
        cost_estimate=pl.CostEstimate(
            flops=4 * n_p * n_p * zp + 2 * n_p * zp * fp,
            transcendentals=0,
            bytes_accessed=esz * (n_p * n_p + 2 * n_p * zp + zp * fp)
            + 4 * (n_p * fp + n_p * n_p)),
    )(adj_c, zmat, zmat, wb2_c)

    return logits_p[:n, :n], xhat_p[:n, :f]


# ---------------------------------------------------------------------------
# References + demo
# ---------------------------------------------------------------------------

def xavier_uniform(key, shape):
    fan_in, fan_out = shape
    limit = np.sqrt(6.0 / (fan_in + fan_out))
    return jax.random.uniform(key, shape, jnp.float32, -limit, limit)


def reference_forward_f32(adj, features, w_base, w_mean, w_logstd, w_base2, noise):
    """Pure-f32 reference in the original PyTorch association order."""
    dot = functools.partial(jnp.dot, precision=jax.lax.Precision.HIGHEST)
    hidden = dot(adj, dot(features, w_base))
    mean = jax.nn.relu(dot(adj, dot(hidden, w_mean)))
    logstd = jax.nn.relu(dot(adj, dot(hidden, w_logstd)))
    z = noise * jnp.exp(logstd) + mean
    return dot(z, z.T), dot(adj, dot(z, w_base2))


def reference_forward_matched(adj, features, w_base, w_mean, w_logstd, w_base2, noise,
                              compute_dtype=jnp.bfloat16):
    """Reference with the same cast points / reassociation as the kernels."""
    cd = compute_dtype
    dot = lambda a, b: jnp.dot(a.astype(cd), b.astype(cd),
                               preferred_element_type=jnp.float32)
    xw = dot(features, w_base).astype(cd)
    hidden = dot(adj, xw).astype(cd)
    t = dot(adj, hidden)                              # f32 accumulator
    mean = jax.nn.relu(dot(t, w_mean))
    logstd = jax.nn.relu(dot(t, w_logstd))
    z = noise.astype(jnp.float32) * jnp.exp(logstd) + mean
    z_cd = z.astype(cd)
    logits = dot(z_cd, z_cd.T)
    x_hat = dot(dot(adj, z_cd), w_base2)
    return logits, x_hat


def _rel_fro(x, ref):
    x = np.asarray(x, dtype=np.float64)
    ref = np.asarray(ref, dtype=np.float64)
    return float(np.linalg.norm(x - ref) / max(np.linalg.norm(ref), 1e-12))


if __name__ == "__main__":
    # Small, deterministic example (grid exercises 2 row tiles per pass).
    N = 256
    DIM_FEATS = 32
    DIM_H = 16
    DIM_Z = 16      # == DIM_H (see TODO(synk) above)

    root = jax.random.PRNGKey(0)
    k_adj, k_feat, k_wb, k_wm, k_wl, k_wb2, k_noise = jax.random.split(root, 7)

    # Symmetric row-normalized adjacency (self-loops included), float32.
    a = (jax.random.uniform(k_adj, (N, N)) < 0.05).astype(jnp.float32)
    a = jnp.maximum(a, a.T) + jnp.eye(N, dtype=jnp.float32)
    adj = a / jnp.sum(a, axis=1, keepdims=True)

    features = jax.random.normal(k_feat, (N, DIM_FEATS), jnp.float32)

    # GCN layer weights (xavier uniform, as in GCNLayer.init_params; biases disabled).
    w_base = xavier_uniform(k_wb, (DIM_FEATS, DIM_H))
    w_mean = xavier_uniform(k_wm, (DIM_H, DIM_Z))
    w_logstd = xavier_uniform(k_wl, (DIM_H, DIM_Z))
    w_base2 = xavier_uniform(k_wb2, (DIM_Z, DIM_FEATS))

    # torch.randn_like(mean) equivalent, generated deterministically host-side.
    noise = jax.random.normal(k_noise, (N, DIM_Z), jnp.float32)

    args = (adj, features, w_base, w_mean, w_logstd, w_base2, noise)

    adj_logits, x_hat = vgae_forward(*args, block_rows=128)
    jax.block_until_ready((adj_logits, x_hat))

    # 1) Tight check vs. a reference with the identical bf16 cast points / fusion
    #    (validates the tiling, padding, reassociation and the mean/logstd fusion).
    ml, mx = reference_forward_matched(*args)
    np.testing.assert_allclose(np.asarray(adj_logits), np.asarray(ml),
                               rtol=1e-2, atol=3e-2)
    np.testing.assert_allclose(np.asarray(x_hat), np.asarray(mx),
                               rtol=1e-2, atol=3e-2)

    # 2) Loose end-to-end check vs. the exact-f32 PyTorch-order reference
    #    (bounds the precision loss from the bf16 adj stream).
    fl, fx = reference_forward_f32(*args)
    assert _rel_fro(adj_logits, fl) < 5e-2, _rel_fro(adj_logits, fl)
    assert _rel_fro(x_hat, fx) < 5e-2, _rel_fro(x_hat, fx)

    print("KERNEL_OK")
</pallas_src>

<mosaic_0001>
module attributes {stable_mosaic.version = 11 : i64} {
  func.func @_xw_kernel(%arg0: i32, %arg1: memref<128x128xbf16, #tpu.memory_space<vmem>>, %arg2: memref<128x128xbf16, #tpu.memory_space<vmem>>, %arg3: memref<128x128xbf16, #tpu.memory_space<vmem>>) attributes {dimension_semantics = [#tpu.dimension_semantics<parallel>], iteration_bounds = array<i64: 2>, scalar_prefetch = 0 : i64, scratch_operands = 0 : i64, tpu.core_type = #tpu.core_type<tc>, window_params = [{transform_indices = @transform_0, window_bounds = array<i64: 128, 128>}, {pipeline_mode = #tpu.pipeline_mode<synchronous>, transform_indices = @transform_1, window_bounds = array<i64: 128, 128>}, {transform_indices = @transform_2, window_bounds = array<i64: 128, 128>}]} {
    %c0 = arith.constant 0 : index
    %c0_0 = arith.constant 0 : index
    %0 = vector.load %arg1[%c0, %c0_0] : memref<128x128xbf16, #tpu.memory_space<vmem>>, vector<128x128xbf16>
    %c0_1 = arith.constant 0 : index
    %c0_2 = arith.constant 0 : index
    %1 = vector.load %arg2[%c0_1, %c0_2] : memref<128x128xbf16, #tpu.memory_space<vmem>>, vector<128x128xbf16>
    %cst = arith.constant dense<0.000000e+00> : vector<128x128xf32>
    %2 = tpu.matmul %0, %1, %cst {dimension_numbers = #tpu.dot_dimension_numbers<[1], [0], [0], [1], [0, 0, 1, 1], [], []>} : vector<128x128xbf16>, vector<128x128xbf16>, vector<128x128xf32> -> vector<128x128xf32>
    %3 = arith.truncf %2 : vector<128x128xf32> to vector<128x128xbf16>
    %c0_3 = arith.constant 0 : index
    %c0_4 = arith.constant 0 : index
    %4 = vector.load %arg3[%c0_3, %c0_4] : memref<128x128xbf16, #tpu.memory_space<vmem>>, vector<128x128xbf16>
    tpu.vector_store %arg3[%c0_3, %c0_4], %3 {strides = array<i32>} : memref<128x128xbf16, #tpu.memory_space<vmem>>, vector<128x128xbf16>,
    return
  }
  func.func @transform_0(%arg0: i32) -> (i32, i32) {
    %c0_i32 = arith.constant 0 : i32
    %c0_i32_0 = arith.constant 0 : i32
    return %arg0, %c0_i32 : i32, i32
  }
  func.func @transform_1(%arg0: i32) -> (i32, i32) {
    %c0_i32 = arith.constant 0 : i32
    %c0_i32_0 = arith.constant 0 : i32
    %c0_i32_1 = arith.constant 0 : i32
    return %c0_i32, %c0_i32_0 : i32, i32
  }
  func.func @transform_2(%arg0: i32) -> (i32, i32) {
    %c0_i32 = arith.constant 0 : i32
    %c0_i32_0 = arith.constant 0 : i32
    return %arg0, %c0_i32 : i32, i32
  }
}

module attributes {stable_mosaic.version = 11 : i64} {
  func.func @_hidden_kernel(%arg0: i32, %arg1: memref<128x256xbf16, #tpu.memory_space<vmem>>, %arg2: memref<256x128xbf16, #tpu.memory_space<vmem>>, %arg3: memref<128x128xbf16, #tpu.memory_space<vmem>>) attributes {dimension_semantics = [#tpu.dimension_semantics<parallel>], iteration_bounds = array<i64: 2>, scalar_prefetch = 0 : i64, scratch_operands = 0 : i64, tpu.core_type = #tpu.core_type<tc>, window_params = [{transform_indices = @transform_0, window_bounds = array<i64: 128, 256>}, {pipeline_mode = #tpu.pipeline_mode<synchronous>, transform_indices = @transform_1, window_bounds = array<i64: 256, 128>}, {transform_indices = @transform_2, window_bounds = array<i64: 128, 128>}]} {
    %c0 = arith.constant 0 : index
    %c0_0 = arith.constant 0 : index
    %0 = vector.load %arg1[%c0, %c0_0] : memref<128x256xbf16, #tpu.memory_space<vmem>>, vector<128x256xbf16>
    %c0_1 = arith.constant 0 : index
    %c0_2 = arith.constant 0 : index
    %1 = vector.load %arg2[%c0_1, %c0_2] : memref<256x128xbf16, #tpu.memory_space<vmem>>, vector<256x128xbf16>
    %cst = arith.constant dense<0.000000e+00> : vector<128x128xf32>
    %2 = tpu.matmul %0, %1, %cst {dimension_numbers = #tpu.dot_dimension_numbers<[1], [0], [0], [1], [0, 0, 1, 1], [], []>} : vector<128x256xbf16>, vector<256x128xbf16>, vector<128x128xf32> -> vector<128x128xf32>
    %3 = arith.truncf %2 : vector<128x128xf32> to vector<128x128xbf16>
    %c0_3 = arith.constant 0 : index
    %c0_4 = arith.constant 0 : index
    %4 = vector.load %arg3[%c0_3, %c0_4] : memref<128x128xbf16, #tpu.memory_space<vmem>>, vector<128x128xbf16>
    tpu.vector_store %arg3[%c0_3, %c0_4], %3 {strides = array<i32>} : memref<128x128xbf16, #tpu.memory_space<vmem>>, vector<128x128xbf16>,
    return
  }
  func.func @transform_0(%arg0: i32) -> (i32, i32) {
    %c0_i32 = arith.constant 0 : i32
    %c0_i32_0 = arith.constant 0 : i32
    return %arg0, %c0_i32 : i32, i32
  }
  func.func @transform_1(%arg0: i32) -> (i32, i32) {
    %c0_i32 = arith.constant 0 : i32
    %c0_i32_0 = arith.constant 0 : i32
    %c0_i32_1 = arith.constant 0 : i32
    return %c0_i32, %c0_i32_0 : i32, i32
  }
  func.func @transform_2(%arg0: i32) -> (i32, i32) {
    %c0_i32 = arith.constant 0 : i32
    %c0_i32_0 = arith.constant 0 : i32
    return %arg0, %c0_i32 : i32, i32
  }
}

module attributes {stable_mosaic.version = 11 : i64} {
  func.func @_z_kernel(%arg0: i32, %arg1: memref<128x256xbf16, #tpu.memory_space<vmem>>, %arg2: memref<256x128xbf16, #tpu.memory_space<vmem>>, %arg3: memref<128x256xbf16, #tpu.memory_space<vmem>>, %arg4: memref<128x128xf32, #tpu.memory_space<vmem>>, %arg5: memref<128x128xbf16, #tpu.memory_space<vmem>>) attributes {dimension_semantics = [#tpu.dimension_semantics<parallel>], iteration_bounds = array<i64: 2>, scalar_prefetch = 0 : i64, scratch_operands = 0 : i64, tpu.core_type = #tpu.core_type<tc>, window_params = [{transform_indices = @transform_0, window_bounds = array<i64: 128, 256>}, {pipeline_mode = #tpu.pipeline_mode<synchronous>, transform_indices = @transform_1, window_bounds = array<i64: 256, 128>}, {pipeline_mode = #tpu.pipeline_mode<synchronous>, transform_indices = @transform_2, window_bounds = array<i64: 128, 256>}, {transform_indices = @transform_3, window_bounds = array<i64: 128, 128>}, {transform_indices = @transform_4, window_bounds = array<i64: 128, 128>}]} {
    %c0 = arith.constant 0 : index
    %c0_0 = arith.constant 0 : index
    %0 = vector.load %arg1[%c0, %c0_0] : memref<128x256xbf16, #tpu.memory_space<vmem>>, vector<128x256xbf16>
    %c0_1 = arith.constant 0 : index
    %c0_2 = arith.constant 0 : index
    %1 = vector.load %arg2[%c0_1, %c0_2] : memref<256x128xbf16, #tpu.memory_space<vmem>>, vector<256x128xbf16>
    %cst = arith.constant dense<0.000000e+00> : vector<128x128xf32>
    %2 = tpu.matmul %0, %1, %cst {dimension_numbers = #tpu.dot_dimension_numbers<[1], [0], [0], [1], [0, 0, 1, 1], [], []>} : vector<128x256xbf16>, vector<256x128xbf16>, vector<128x128xf32> -> vector<128x128xf32>
    %3 = arith.truncf %2 : vector<128x128xf32> to vector<128x128xbf16>
    %c0_3 = arith.constant 0 : index
    %c0_4 = arith.constant 0 : index
    %4 = vector.load %arg3[%c0_3, %c0_4] : memref<128x256xbf16, #tpu.memory_space<vmem>>, vector<128x256xbf16>
    %cst_5 = arith.constant dense<0.000000e+00> : vector<128x256xf32>
    %5 = tpu.matmul %3, %4, %cst_5 {dimension_numbers = #tpu.dot_dimension_numbers<[1], [0], [0], [1], [0, 0, 1, 1], [], []>} : vector<128x128xbf16>, vector<128x256xbf16>, vector<128x256xf32> -> vector<128x256xf32>
    %6 = vector.extract_strided_slice %5 {offsets = [0, 0], sizes = [128, 128], strides = [1, 1]} : vector<128x256xf32> to vector<128x128xf32>
    %cst_6 = arith.constant 0.000000e+00 : f32
    %7 = vector.broadcast %cst_6 : f32 to vector<128x128xf32>
    %8 = arith.maximumf %6, %7 : vector<128x128xf32>
    %9 = vector.extract_strided_slice %5 {offsets = [0, 128], sizes = [128, 128], strides = [1, 1]} : vector<128x256xf32> to vector<128x128xf32>
    %cst_7 = arith.constant 0.000000e+00 : f32
    %10 = vector.broadcast %cst_7 : f32 to vector<128x128xf32>
    %11 = arith.maximumf %9, %10 : vector<128x128xf32>
    %c0_8 = arith.constant 0 : index
    %c0_9 = arith.constant 0 : index
    %12 = vector.load %arg4[%c0_8, %c0_9] : memref<128x128xf32, #tpu.memory_space<vmem>>, vector<128x128xf32>
    %13 = math.exp %11 : vector<128x128xf32>
    %14 = arith.mulf %12, %13 : vector<128x128xf32>
    %15 = arith.addf %14, %8 : vector<128x128xf32>
    %16 = arith.truncf %15 : vector<128x128xf32> to vector<128x128xbf16>
    %c0_10 = arith.constant 0 : index
    %c0_11 = arith.constant 0 : index
    %17 = vector.load %arg5[%c0_10, %c0_11] : memref<128x128xbf16, #tpu.memory_space<vmem>>, vector<128x128xbf16>
    tpu.vector_store %arg5[%c0_10, %c0_11], %16 {strides = array<i32>} : memref<128x128xbf16, #tpu.memory_space<vmem>>, vector<128x128xbf16>,
    return
  }
  func.func @transform_0(%arg0: i32) -> (i32, i32) {
    %c0_i32 = arith.constant 0 : i32
    %c0_i32_0 = arith.constant 0 : i32
    return %arg0, %c0_i32 : i32, i32
  }
  func.func @transform_1(%arg0: i32) -> (i32, i32) {
    %c0_i32 = arith.constant 0 : i32
    %c0_i32_0 = arith.constant 0 : i32
    %c0_i32_1 = arith.constant 0 : i32
    return %c0_i32, %c0_i32_0 : i32, i32
  }
  func.func @transform_2(%arg0: i32) -> (i32, i32) {
    %c0_i32 = arith.constant 0 : i32
    %c0_i32_0 = arith.constant 0 : i32
    %c0_i32_1 = arith.constant 0 : i32
    return %c0_i32, %c0_i32_0 : i32, i32
  }
  func.func @transform_3(%arg0: i32) -> (i32, i32) {
    %c0_i32 = arith.constant 0 : i32
    %c0_i32_0 = arith.constant 0 : i32
    return %arg0, %c0_i32 : i32, i32
  }
  func.func @transform_4(%arg0: i32) -> (i32, i32) {
    %c0_i32 = arith.constant 0 : i32
    %c0_i32_0 = arith.constant 0 : i32
    return %arg0, %c0_i32 : i32, i32
  }
}

module attributes {stable_mosaic.version = 11 : i64} {
  func.func @_xhat_logits_kernel(%arg0: i32, %arg1: memref<128x256xbf16, #tpu.memory_space<vmem>>, %arg2: memref<256x128xbf16, #tpu.memory_space<vmem>>, %arg3: memref<128x128xbf16, #tpu.memory_space<vmem>>, %arg4: memref<128x128xbf16, #tpu.memory_space<vmem>>, %arg5: memref<128x128xf32, #tpu.memory_space<vmem>>, %arg6: memref<128x256xf32, #tpu.memory_space<vmem>>) attributes {dimension_semantics = [#tpu.dimension_semantics<parallel>], iteration_bounds = array<i64: 2>, scalar_prefetch = 0 : i64, scratch_operands = 0 : i64, tpu.core_type = #tpu.core_type<tc>, window_params = [{transform_indices = @transform_0, window_bounds = array<i64: 128, 256>}, {pipeline_mode = #tpu.pipeline_mode<synchronous>, transform_indices = @transform_1, window_bounds = array<i64: 256, 128>}, {transform_indices = @transform_2, window_bounds = array<i64: 128, 128>}, {pipeline_mode = #tpu.pipeline_mode<synchronous>, transform_indices = @transform_3, window_bounds = array<i64: 128, 128>}, {transform_indices = @transform_4, window_bounds = array<i64: 128, 128>}, {transform_indices = @transform_5, window_bounds = array<i64: 128, 256>}]} {
    %c0 = arith.constant 0 : index
    %c0_0 = arith.constant 0 : index
    %0 = vector.load %arg1[%c0, %c0_0] : memref<128x256xbf16, #tpu.memory_space<vmem>>, vector<128x256xbf16>
    %c0_1 = arith.constant 0 : index
    %c0_2 = arith.constant 0 : index
    %1 = vector.load %arg2[%c0_1, %c0_2] : memref<256x128xbf16, #tpu.memory_space<vmem>>, vector<256x128xbf16>
    %cst = arith.constant dense<0.000000e+00> : vector<128x128xf32>
    %2 = tpu.matmul %0, %1, %cst {dimension_numbers = #tpu.dot_dimension_numbers<[1], [0], [0], [1], [0, 0, 1, 1], [], []>} : vector<128x256xbf16>, vector<256x128xbf16>, vector<128x128xf32> -> vector<128x128xf32>
    %3 = arith.truncf %2 : vector<128x128xf32> to vector<128x128xbf16>
    %c0_3 = arith.constant 0 : index
    %c0_4 = arith.constant 0 : index
    %4 = vector.load %arg4[%c0_3, %c0_4] : memref<128x128xbf16, #tpu.memory_space<vmem>>, vector<128x128xbf16>
    %cst_5 = arith.constant dense<0.000000e+00> : vector<128x128xf32>
    %5 = tpu.matmul %3, %4, %cst_5 {dimension_numbers = #tpu.dot_dimension_numbers<[1], [0], [0], [1], [0, 0, 1, 1], [], []>} : vector<128x128xbf16>, vector<128x128xbf16>, vector<128x128xf32> -> vector<128x128xf32>
    %c0_6 = arith.constant 0 : index
    %c0_7 = arith.constant 0 : index
    %6 = vector.load %arg5[%c0_6, %c0_7] : memref<128x128xf32, #tpu.memory_space<vmem>>, vector<128x128xf32>
    tpu.vector_store %arg5[%c0_6, %c0_7], %5 {strides = array<i32>} : memref<128x128xf32, #tpu.memory_space<vmem>>, vector<128x128xf32>,
    %c0_8 = arith.constant 0 : index
    %c0_9 = arith.constant 0 : index
    %7 = vector.load %arg3[%c0_8, %c0_9] : memref<128x128xbf16, #tpu.memory_space<vmem>>, vector<128x128xbf16>
    %c0_10 = arith.constant 0 : index
    %c0_11 = arith.constant 0 : index
    %8 = vector.load %arg2[%c0_10, %c0_11] : memref<256x128xbf16, #tpu.memory_space<vmem>>, vector<256x128xbf16>
    %cst_12 = arith.constant dense<0.000000e+00> : vector<128x256xf32>
    %9 = tpu.matmul %7, %8, %cst_12 {dimension_numbers = #tpu.dot_dimension_numbers<[1], [1], [0], [0], [0, 0, 1, 0], [], []>} : vector<128x128xbf16>, vector<256x128xbf16>, vector<128x256xf32> -> vector<128x256xf32>
    %c0_13 = arith.constant 0 : index
    %c0_14 = arith.constant 0 : index
    %10 = vector.load %arg6[%c0_13, %c0_14] : memref<128x256xf32, #tpu.memory_space<vmem>>, vector<128x256xf32>
    tpu.vector_store %arg6[%c0_13, %c0_14], %9 {strides = array<i32>} : memref<128x256xf32, #tpu.memory_space<vmem>>, vector<128x256xf32>,
    return
  }
  func.func @transform_0(%arg0: i32) -> (i32, i32) {
    %c0_i32 = arith.constant 0 : i32
    %c0_i32_0 = arith.constant 0 : i32
    return %arg0, %c0_i32 : i32, i32
  }
  func.func @transform_1(%arg0: i32) -> (i32, i32) {
    %c0_i32 = arith.constant 0 : i32
    %c0_i32_0 = arith.constant 0 : i32
    %c0_i32_1 = arith.constant 0 : i32
    return %c0_i32, %c0_i32_0 : i32, i32
  }
  func.func @transform_2(%arg0: i32) -> (i32, i32) {
    %c0_i32 = arith.constant 0 : i32
    %c0_i32_0 = arith.constant 0 : i32
    return %arg0, %c0_i32 : i32, i32
  }
  func.func @transform_3(%arg0: i32) -> (i32, i32) {
    %c0_i32 = arith.constant 0 : i32
    %c0_i32_0 = arith.constant 0 : i32
    %c0_i32_1 = arith.constant 0 : i32
    return %c0_i32, %c0_i32_0 : i32, i32
  }
  func.func @transform_4(%arg0: i32) -> (i32, i32) {
    %c0_i32 = arith.constant 0 : i32
    %c0_i32_0 = arith.constant 0 : i32
    return %arg0, %c0_i32 : i32, i32
  }
  func.func @transform_5(%arg0: i32) -> (i32, i32) {
    %c0_i32 = arith.constant 0 : i32
    %c0_i32_0 = arith.constant 0 : i32
    return %arg0, %c0_i32 : i32, i32
  }
}

</mosaic_0001>

<bundles_post_ra>
// kernel: vgae_forward.5
= control target key start
LH: loop header
LB: loop body
LE: loop exit
PB: predicated region body
PF: predicated region fallthrough
CT: control target
= control target key end

     0   :  { %s883_s9 = smov 0   ;;  %s980_s0 = inlined_call_operand.vmem [shape: bf16[256,256], index: 0, kind: input, shape index: {}]   ;;  %s981_s1 = inlined_call_operand.vmem [shape: bf16[256,128], index: 1, kind: input, shape index: {}]   ;;  %s982_s2 = inlined_call_operand.vmem [shape: bf16[256,128], index: 2, kind: output, shape index: {}]  }
   0x1 LB: > { %s608_s10 = sadd.s32 4294967295, %s866_s9   ;;  %p612_p0 = scmp.ge.s32.totalorder %s866_s9, 1  ;;  %s866_s9 = sphi %s883_s9, %s12_s9  }
   0x2   : > { %p114_p1 = scmp.lt.s32.totalorder %s866_s9, 3 }
   0x4   : > { %p115_p2 = pnand %p612_p0, %p114_p1 }
   0x5   : > { %v820_v0 = vld [vmem:[%s981_s1 + $0x40] sm:$0xff] (!%p115_p2)   ;;  %s613_s13 = sshll.u32 (!%p115_p2), %s608_s10, 4  ;;  %v822_v2 = vld [vmem:[%s981_s1 + $0x48] sm:$0xff] (!%p115_p2)   ;;  %v824_v4 = vld [vmem:[%s981_s1 + $0x50] sm:$0xff] (!%p115_p2)  }
   0x6   : > { %118 = sbr.rel (%p115_p2) target bundleno = 282 (0x11a), region = 28  ;;  %v821_v1 = vld [vmem:[%s981_s1] sm:$0xff] (!%p115_p2)   ;;  %732 = vmatprep.subr.bf16.mxu0 (!%p115_p2), %v820_v0  ;;  %796 = vmatprep.subr.bf16.mxu1 (!%p115_p2), %v820_v0  ;;  %v823_v3 = vld [vmem:[%s981_s1 + $0x8] sm:$0xff] (!%p115_p2)   ;;  %p138_p3 = scmp.lt.s32.totalorder (!%p115_p2), %s613_s13, 31  ;;  %v825_v5 = vld [vmem:[%s981_s1 + $0x10] sm:$0xff] (!%p115_p2)  }
   0x7   : > { %733 = vmatpush3.bf16.msra.mxu0 (!%p115_p2), %v821_v1  ;;  %804 = vmatpush3.bf16.msra.mxu1 (!%p115_p2), %v821_v1  ;;  %v826_v6 = vld [vmem:[%s981_s1 + $0x58] sm:$0xff] (!%p115_p2)   ;;  %v828_v8 = vld [vmem:[%s981_s1 + $0x60] sm:$0xff] (!%p115_p2)   ;;  %v830_v10 = vld [vmem:[%s981_s1 + $0x68] sm:$0xff] (!%p115_p2)  }
   0x8   : > { %734 = vmatprep.subr.bf16.mxu0 (!%p115_p2), %v822_v2  ;;  %797 = vmatprep.subr.bf16.mxu1 (!%p115_p2), %v822_v2  ;;  %v827_v7 = vld [vmem:[%s981_s1 + $0x18] sm:$0xff] (!%p115_p2)   ;;  %v829_v9 = vld [vmem:[%s981_s1 + $0x20] sm:$0xff] (!%p115_p2)   ;;  %v831_v13 = vld [vmem:[%s981_s1 + $0x28] sm:$0xff] (!%p115_p2)  }
   0x9   : > { %v832_v14 = vld [vmem:[%s981_s1 + $0x70] sm:$0xff] (!%p115_p2)   ;;  %v834_v16 = vld [vmem:[%s981_s1 + $0x78] sm:$0xff] (!%p115_p2)  }
   0xa   : > { %v833_v15 = vld [vmem:[%s981_s1 + $0x30] sm:$0xff] (!%p115_p2)   ;;  %v835_v17 = vld [vmem:[%s981_s1 + $0x38] sm:$0xff] (!%p115_p2)  }
   0xb   : > { %735 = vmatpush3.bf16.msra.mxu0 (!%p115_p2), %v823_v3  ;;  %805 = vmatpush3.bf16.msra.mxu1 (!%p115_p2), %v823_v3 }
   0xc   : > { %736 = vmatprep.subr.bf16.mxu0 (!%p115_p2), %v824_v4  ;;  %798 = vmatprep.subr.bf16.mxu1 (!%p115_p2), %v824_v4 }
   0xd   : > { %s984_s13 = smov (!%p138_p3, %s613_s13), 31 }
   0xe   : > { %s668_s28 = sshll.u32 %s984_s13, 3  ;;  %s617_s22 = sshll.u32 %s984_s13, 2 }
   0xf   : > { %737 = vmatpush3.bf16.msra.mxu0 %v825_v5  ;;  %806 = vmatpush3.bf16.msra.mxu1 %v825_v5  ;;  %s924_s5 = scalar_lea.vmem %s980_s0, %s668_s28  ;;  %s967_s25 = scalar_lea.vmem %s982_s2, %s617_s22 }
  0x10   : > { %738 = vmatprep.subr.bf16.mxu0 %v826_v6  ;;  %799 = vmatprep.subr.bf16.mxu1 %v826_v6  ;;  %v838_v11 = vld [vmem:[%s924_s5 + $0x4] ss:$8 sps:$4 sm:$0xff]   ;;  %v836_v18 = vld [vmem:[%s924_s5] ss:$8 sps:$4 sm:$0xff]   ;;  %v842_v20 = vld [vmem:[%s924_s5 + $0x14] ss:$8 sps:$4 sm:$0xff]  }
  0x11   : > { %v841_v12 = vld [vmem:[%s924_s5 + $0x44] ss:$8 sps:$4 sm:$0xff]   ;;  %407 = vmatprep.mubr.bf16.mxu0 %v838_v11  ;;  %v839_v19 = vld [vmem:[%s924_s5 + $0x40] ss:$8 sps:$4 sm:$0xff]   ;;  %v844_v21 = vld [vmem:[%s924_s5 + $0x54] ss:$8 sps:$4 sm:$0xff]  }
  0x12   : > { %439 = vmatprep.mubr.bf16.mxu1 %v841_v12  ;;  %v846_v22 = vld [vmem:[%s924_s5 + $0x10] ss:$8 sps:$4 sm:$0xff]   ;;  %v848_v24 = vld [vmem:[%s924_s5 + $0x24] ss:$8 sps:$4 sm:$0xff]   ;;  %v852_v26 = vld [vmem:[%s924_s5 + $0x20] ss:$8 sps:$4 sm:$0xff]  }
  0x13   : > { %739 = vmatpush3.bf16.msra.mxu0 %v827_v7  ;;  %807 = vmatpush3.bf16.msra.mxu1 %v827_v7  ;;  %v847_v23 = vld [vmem:[%s924_s5 + $0x50] ss:$8 sps:$4 sm:$0xff]   ;;  %v850_v25 = vld [vmem:[%s924_s5 + $0x64] ss:$8 sps:$4 sm:$0xff]   ;;  %v853_v27 = vld [vmem:[%s924_s5 + $0x60] ss:$8 sps:$4 sm:$0xff]  }
  0x14   : > { %740 = vmatprep.subr.bf16.mxu0 %v828_v8  ;;  %800 = vmatprep.subr.bf16.mxu1 %v828_v8  ;;  %v854_v28 = vld [vmem:[%s924_s5 + $0x34] ss:$8 sps:$4 sm:$0xff]   ;;  %v858_v30 = vld [vmem:[%s924_s5 + $0x30] ss:$8 sps:$4 sm:$0xff]  }
  0x15   : > { %v856_v29 = vld [vmem:[%s924_s5 + $0x74] ss:$8 sps:$4 sm:$0xff]   ;;  %v859_v31 = vld [vmem:[%s924_s5 + $0x70] ss:$8 sps:$4 sm:$0xff]  }
  0x17   : > { %741 = vmatpush3.bf16.msra.mxu0 %v829_v9  ;;  %808 = vmatpush3.bf16.msra.mxu1 %v829_v9 }
  0x18   : > { %742 = vmatprep.subr.bf16.mxu0 %v830_v10  ;;  %801 = vmatprep.subr.bf16.mxu1 %v830_v10 }
  0x1b   : > { %743 = vmatpush3.bf16.msra.mxu0 %v831_v13  ;;  %809 = vmatpush3.bf16.msra.mxu1 %v831_v13 }
  0x1c   : > { %744 = vmatprep.subr.bf16.mxu0 %v832_v14  ;;  %802 = vmatprep.subr.bf16.mxu1 %v832_v14 }
  0x1f   : > { %745 = vmatpush3.bf16.msra.mxu0 %v833_v15  ;;  %810 = vmatpush3.bf16.msra.mxu1 %v833_v15 }
  0x20   : > { %746 = vmatprep.subr.bf16.mxu0 %v834_v16  ;;  %803 = vmatprep.subr.bf16.mxu1 %v834_v16 }
  0x23   : > { %747 = vmatpush3.bf16.msra.mxu0 %v835_v17  ;;  %811 = vmatpush3.bf16.msra.mxu1 %v835_v17 }
  0x26   : > { %408 = vmatmul.mubr.bf16.vlgmr.msra.gmra.mrb[0].mxu0 %v836_v18  ;;  %440 = vmatmul.mubr.bf16.vlgmr.msra.gmra.mrb[0].mxu1 %v839_v19 }
  0x27   : > { %415 = vmatprep.mubr.bf16.mxu0 %v842_v20  ;;  %447 = vmatprep.mubr.bf16.mxu1 %v844_v21 }
  0x2e   : > { %416 = vmatmul.mubr.bf16.gmra.mrb[4].mxu0 %v846_v22  ;;  %448 = vmatmul.mubr.bf16.gmra.mrb[4].mxu1 %v847_v23 }
  0x2f   : > { %423 = vmatprep.mubr.bf16.mxu0 %v848_v24  ;;  %455 = vmatprep.mubr.bf16.mxu1 %v850_v25 }
  0x36   : > { %424 = vmatmul.mubr.bf16.gmra.mrb[8].mxu0 %v852_v26  ;;  %456 = vmatmul.mubr.bf16.gmra.mrb[8].mxu1 %v853_v27 }
  0x37   : > { %431 = vmatprep.mubr.bf16.mxu0 %v854_v28  ;;  %463 = vmatprep.mubr.bf16.mxu1 %v856_v29 }
  0x3e   : > { %432 = vmatmul.mubr.bf16.gmra.mrb[12].mxu0 %v858_v30  ;;  %464 = vmatmul.mubr.bf16.gmra.mrb[12].mxu1 %v859_v31 }
  0xf9   : > { %v748_v32 = vpop.f32.mrb[0].mxu0  ;;  %v772_v33 = vpop.f32.mrb[0].mxu1 }
  0xfa   : > { %v749_v34 = vpop.f32.mrb[1].mxu0  ;;  %v773_v35 = vpop.f32.mrb[1].mxu1 }
  0xfb   : > { %v750_v36 = vadd.f32 %v749_v34, %v748_v32  ;;  %v774_v37 = vadd.f32 %v773_v35, %v772_v33  ;;  %v751_v38 = vpop.f32.mrb[2].mxu0  ;;  %v775_v39 = vpop.f32.mrb[2].mxu1 }
  0xfc   : > { %v752_v40 = vpop.f32.mrb[3].mxu0  ;;  %v776_v41 = vpop.f32.mrb[3].mxu1 }
  0xfd   : > { %v753_v42 = vadd.f32 %v752_v40, %v751_v38  ;;  %v777_v43 = vadd.f32 %v776_v41, %v775_v39 }
  0xff   : > { %v688_v44 = vpack.c.bf16 %v753_v42, %v750_v36  ;;  %v708_v45 = vpack.c.bf16 %v777_v43, %v774_v37 }
 0x101   : > { %689 = vst [vmem:[%s967_s25] sm:$0xff] %v688_v44   ;;  %728 = vst [vmem:[%s967_s25 + $0x20] sm:$0xff] %v708_v45   ;;  %v754_v46 = vpop.f32.mrb[4].mxu0  ;;  %v778_v47 = vpop.f32.mrb[4].mxu1 }
 0x102   : > { %v755_v48 = vpop.f32.mrb[5].mxu0  ;;  %v779_v49 = vpop.f32.mrb[5].mxu1 }
 0x103   : > { %v756_v50 = vadd.f32 %v755_v48, %v754_v46  ;;  %v780_v51 = vadd.f32 %v779_v49, %v778_v47  ;;  %v757_v52 = vpop.f32.mrb[6].mxu0  ;;  %v781_v53 = vpop.f32.mrb[6].mxu1 }
 0x104   : > { %v758_v54 = vpop.f32.mrb[7].mxu0  ;;  %v782_v55 = vpop.f32.mrb[7].mxu1 }
 0x105   : > { %v759_v56 = vadd.f32 %v758_v54, %v757_v52  ;;  %v783_v57 = vadd.f32 %v782_v55, %v781_v53 }
 0x107   : > { %v693_v58 = vpack.c.bf16 %v759_v56, %v756_v50  ;;  %v713_v59 = vpack.c.bf16 %v783_v57, %v780_v51 }
 0x109   : > { %725 = vst [vmem:[%s967_s25 + $0x8] sm:$0xff] %v693_v58   ;;  %729 = vst [vmem:[%s967_s25 + $0x28] sm:$0xff] %v713_v59   ;;  %v760_v60 = vpop.f32.mrb[8].mxu0  ;;  %v784_v61 = vpop.f32.mrb[8].mxu1 }
 0x10a   : > { %v761_v62 = vpop.f32.mrb[9].mxu0  ;;  %v785_v63 = vpop.f32.mrb[9].mxu1 }
 0x10b   : > { %v762_v0 = vadd.f32 %v761_v62, %v760_v60  ;;  %v786_v1 = vadd.f32 %v785_v63, %v784_v61  ;;  %v763_v2 = vpop.f32.mrb[10].mxu0  ;;  %v787_v3 = vpop.f32.mrb[10].mxu1 }
 0x10c   : > { %v764_v4 = vpop.f32.mrb[11].mxu0  ;;  %v788_v5 = vpop.f32.mrb[11].mxu1 }
 0x10d   : > { %v765_v6 = vadd.f32 %v764_v4, %v763_v2  ;;  %v789_v7 = vadd.f32 %v788_v5, %v787_v3 }
 0x10f   : > { %v698_v8 = vpack.c.bf16 %v765_v6, %v762_v0  ;;  %v718_v9 = vpack.c.bf16 %v789_v7, %v786_v1 }
 0x111   : > { %726 = vst [vmem:[%s967_s25 + $0x10] sm:$0xff] %v698_v8   ;;  %730 = vst [vmem:[%s967_s25 + $0x30] sm:$0xff] %v718_v9   ;;  %v766_v10 = vpop.f32.mrb[12].mxu0  ;;  %v790_v11 = vpop.f32.mrb[12].mxu1 }
 0x112   : > { %v767_v12 = vpop.f32.mrb[13].mxu0  ;;  %v791_v13 = vpop.f32.mrb[13].mxu1 }
 0x113   : > { %v768_v14 = vadd.f32 %v767_v12, %v766_v10  ;;  %v792_v15 = vadd.f32 %v791_v13, %v790_v11  ;;  %v769_v16 = vpop.f32.mrb[14].mxu0  ;;  %v793_v17 = vpop.f32.mrb[14].mxu1 }
 0x114   : > { %v770_v18 = vpop.f32.mrb[15].mxu0  ;;  %v794_v19 = vpop.f32.mrb[15].mxu1 }
 0x115   : > { %v771_v20 = vadd.f32 %v770_v18, %v769_v16  ;;  %v795_v21 = vadd.f32 %v794_v19, %v793_v17 }
 0x117   : > { %v703_v22 = vpack.c.bf16 %v771_v20, %v768_v14  ;;  %v723_v23 = vpack.c.bf16 %v795_v21, %v792_v15 }
 0x119   : > { %727 = vst [vmem:[%s967_s25 + $0x18] sm:$0xff] %v703_v22   ;;  %731 = vst [vmem:[%s967_s25 + $0x38] sm:$0xff] %v723_v23  }
 0x11a PF: > { %s12_s9 = sadd.s32 1, %s866_s9  }
 0x11b   : > { %p9_p4 = scmp.ge.s32.totalorder %s12_s9, 4  }
 0x11d   :  { %11 = sbr.rel (!%p9_p4) target bundleno = 1 (0x1), region = 58 }

// kernel: vgae_forward.4
= control target key start
LH: loop header
LB: loop body
LE: loop exit
PB: predicated region body
PF: predicated region fallthrough
CT: control target
= control target key end

     0   :  { %s726_s9 = smov 0   ;;  %s784_s0 = inlined_call_operand.vmem [shape: bf16[256,128], index: 0, kind: input, shape index: {}]   ;;  %s785_s1 = inlined_call_operand.vmem [shape: bf16[128,128], index: 1, kind: input, shape index: {}]   ;;  %s786_s2 = inlined_call_operand.vmem [shape: bf16[256,128], index: 2, kind: output, shape index: {}]  }
   0x1 LB: > { %s509_s10 = sadd.s32 4294967295, %s709_s9   ;;  %p513_p0 = scmp.ge.s32.totalorder %s709_s9, 1  ;;  %s709_s9 = sphi %s726_s9, %s12_s9  }
   0x2   : > { %p113_p1 = scmp.lt.s32.totalorder %s709_s9, 3 }
   0x4   : > { %p114_p2 = pnand %p513_p0, %p113_p1 }
   0x5   : > { %v687_v0 = vld [vmem:[%s785_s1] sm:$0xff] (!%p114_p2)   ;;  %s514_s13 = sshll.u32 (!%p114_p2), %s509_s10, 4  ;;  %v688_v1 = vld [vmem:[%s785_s1 + $0x8] sm:$0xff] (!%p114_p2)   ;;  %v689_v2 = vld [vmem:[%s785_s1 + $0x10] sm:$0xff] (!%p114_p2)  }
   0x6   : > { %117 = sbr.rel (%p114_p2) target bundleno = 264 (0x108), region = 28  ;;  %p136_p3 = scmp.lt.s32.totalorder (!%p114_p2), %s514_s13, 31  ;;  %631 = vmatprep.subr.bf16.mxu0 (!%p114_p2), %v687_v0  ;;  %663 = vmatprep.subr.bf16.mxu1 (!%p114_p2), %v687_v0  ;;  %v690_v3 = vld [vmem:[%s785_s1 + $0x18] sm:$0xff] (!%p114_p2)   ;;  %v691_v6 = vld [vmem:[%s785_s1 + $0x20] sm:$0xff] (!%p114_p2)   ;;  %v692_v7 = vld [vmem:[%s785_s1 + $0x28] sm:$0xff] (!%p114_p2)  }
   0x7   : > { %632 = vmatpush3.bf16.msra.mxu0 (!%p114_p2), %v687_v0  ;;  %671 = vmatpush3.bf16.msra.mxu1 (!%p114_p2), %v687_v0  ;;  %v693_v8 = vld [vmem:[%s785_s1 + $0x30] sm:$0xff] (!%p114_p2)   ;;  %v694_v9 = vld [vmem:[%s785_s1 + $0x38] sm:$0xff] (!%p114_p2)  }
   0x8   : > { %633 = vmatprep.subr.bf16.mxu0 (!%p114_p2), %v688_v1  ;;  %664 = vmatprep.subr.bf16.mxu1 (!%p114_p2), %v688_v1 }
   0xb   : > { %634 = vmatpush3.bf16.msra.mxu0 (!%p114_p2), %v688_v1  ;;  %672 = vmatpush3.bf16.msra.mxu1 (!%p114_p2), %v688_v1 }
   0xc   : > { %635 = vmatprep.subr.bf16.mxu0 (!%p114_p2), %v689_v2  ;;  %665 = vmatprep.subr.bf16.mxu1 (!%p114_p2), %v689_v2 }
   0xd   : > { %s788_s13 = smov (!%p136_p3, %s514_s13), 31 }
   0xe   : > { %s515_s18 = sshll.u32 %s788_s13, 2 }
   0xf   : > { %s751_s21 = scalar_lea.vmem %s784_s0, %s515_s18  ;;  %636 = vmatpush3.bf16.msra.mxu0 %v689_v2  ;;  %673 = vmatpush3.bf16.msra.mxu1 %v689_v2  ;;  %s145_s6 = scalar_lea.vmem %s786_s2, %s515_s18 }
  0x10   : > { %v695_v4 = vld [vmem:[%s751_s21] sm:$0xff]   ;;  %637 = vmatprep.subr.bf16.mxu0 %v690_v3  ;;  %666 = vmatprep.subr.bf16.mxu1 %v690_v3  ;;  %v697_v10 = vld [vmem:[%s751_s21 + $0x8] sm:$0xff]   ;;  %v699_v12 = vld [vmem:[%s751_s21 + $0x10] sm:$0xff]  }
  0x11   : > { %v696_v5 = vld [vmem:[%s751_s21 + $0x20] sm:$0xff]   ;;  %647 = vmatprep.mubr.bf16.mxu0 %v695_v4  ;;  %v698_v11 = vld [vmem:[%s751_s21 + $0x28] sm:$0xff]   ;;  %v700_v13 = vld [vmem:[%s751_s21 + $0x30] sm:$0xff]  }
  0x12   : > { %655 = vmatprep.mubr.bf16.mxu1 %v696_v5  ;;  %v701_v14 = vld [vmem:[%s751_s21 + $0x18] sm:$0xff]  }
  0x13   : > { %638 = vmatpush3.bf16.msra.mxu0 %v690_v3  ;;  %674 = vmatpush3.bf16.msra.mxu1 %v690_v3  ;;  %v702_v15 = vld [vmem:[%s751_s21 + $0x38] sm:$0xff]  }
  0x14   : > { %639 = vmatprep.subr.bf16.mxu0 %v691_v6  ;;  %667 = vmatprep.subr.bf16.mxu1 %v691_v6 }
  0x17   : > { %640 = vmatpush3.bf16.msra.mxu0 %v691_v6  ;;  %675 = vmatpush3.bf16.msra.mxu1 %v691_v6 }
  0x18   : > { %641 = vmatprep.subr.bf16.mxu0 %v692_v7  ;;  %668 = vmatprep.subr.bf16.mxu1 %v692_v7 }
  0x1b   : > { %642 = vmatpush3.bf16.msra.mxu0 %v692_v7  ;;  %676 = vmatpush3.bf16.msra.mxu1 %v692_v7 }
  0x1c   : > { %643 = vmatprep.subr.bf16.mxu0 %v693_v8  ;;  %669 = vmatprep.subr.bf16.mxu1 %v693_v8 }
  0x1f   : > { %644 = vmatpush3.bf16.msra.mxu0 %v693_v8  ;;  %677 = vmatpush3.bf16.msra.mxu1 %v693_v8 }
  0x20   : > { %645 = vmatprep.subr.bf16.mxu0 %v694_v9  ;;  %670 = vmatprep.subr.bf16.mxu1 %v694_v9 }
  0x23   : > { %646 = vmatpush3.bf16.msra.mxu0 %v694_v9  ;;  %678 = vmatpush3.bf16.msra.mxu1 %v694_v9 }
  0x26   : > { %648 = vmatmul.mubr.bf16.vlgmr.msra.gmra.mrb[0].mxu0 %v697_v10  ;;  %656 = vmatmul.mubr.bf16.vlgmr.msra.gmra.mrb[0].mxu1 %v698_v11 }
  0x27   : > { %651 = vmatprep.mubr.bf16.mxu0 %v699_v12  ;;  %659 = vmatprep.mubr.bf16.mxu1 %v700_v13 }
  0x2e   : > { %652 = vmatmul.mubr.bf16.gmra.mrb[4].mxu0 %v701_v14  ;;  %660 = vmatmul.mubr.bf16.gmra.mrb[4].mxu1 %v702_v15 }
  0xf9   : > { %v649_v16 = vpop.f32.mrb[0].mxu0  ;;  %v657_v17 = vpop.f32.mrb[0].mxu1 }
  0xfa   : > { %v310_v18 = vpop.f32.mrb[1].mxu0  ;;  %v342_v19 = vpop.f32.mrb[1].mxu1 }
  0xfb   : > { %v650_v20 = vpop.f32.mrb[2].mxu0  ;;  %v658_v21 = vpop.f32.mrb[2].mxu1 }
  0xfc   : > { %v576_v22 = vpack.c.bf16 %v650_v20, %v649_v16  ;;  %v596_v23 = vpack.c.bf16 %v658_v21, %v657_v17  ;;  %v313_v24 = vpop.f32.mrb[3].mxu0  ;;  %v345_v25 = vpop.f32.mrb[3].mxu1 }
  0xfd   : > { %v571_v26 = vpack.c.bf16 %v313_v24, %v310_v18  ;;  %v591_v27 = vpack.c.bf16 %v345_v25, %v342_v19 }
  0xfe   : > { %608 = vst [vmem:[%s145_s6 + $0x8] sm:$0xff] %v576_v22   ;;  %612 = vst [vmem:[%s145_s6 + $0x28] sm:$0xff] %v596_v23  }
  0xff   : > { %572 = vst [vmem:[%s145_s6] sm:$0xff] %v571_v26   ;;  %611 = vst [vmem:[%s145_s6 + $0x20] sm:$0xff] %v591_v27  }
 0x101   : > { %v653_v28 = vpop.f32.mrb[4].mxu0  ;;  %v661_v29 = vpop.f32.mrb[4].mxu1 }
 0x102   : > { %v326_v30 = vpop.f32.mrb[5].mxu0  ;;  %v358_v31 = vpop.f32.mrb[5].mxu1 }
 0x103   : > { %v654_v32 = vpop.f32.mrb[6].mxu0  ;;  %v662_v33 = vpop.f32.mrb[6].mxu1 }
 0x104   : > { %v586_v34 = vpack.c.bf16 %v654_v32, %v653_v28  ;;  %v606_v35 = vpack.c.bf16 %v662_v33, %v661_v29  ;;  %v329_v36 = vpop.f32.mrb[7].mxu0  ;;  %v361_v37 = vpop.f32.mrb[7].mxu1 }
 0x105   : > { %v581_v38 = vpack.c.bf16 %v329_v36, %v326_v30  ;;  %v601_v39 = vpack.c.bf16 %v361_v37, %v358_v31 }
 0x106   : > { %610 = vst [vmem:[%s145_s6 + $0x18] sm:$0xff] %v586_v34   ;;  %614 = vst [vmem:[%s145_s6 + $0x38] sm:$0xff] %v606_v35  }
 0x107   : > { %609 = vst [vmem:[%s145_s6 + $0x10] sm:$0xff] %v581_v38   ;;  %613 = vst [vmem:[%s145_s6 + $0x30] sm:$0xff] %v601_v39  }
 0x108 PF: > { %s12_s9 = sadd.s32 1, %s709_s9  }
 0x109   : > { %p9_p4 = scmp.ge.s32.totalorder %s12_s9, 4  }
 0x10b   :  { %11 = sbr.rel (!%p9_p4) target bundleno = 1 (0x1), region = 58 }

// kernel: vgae_forward.6
= control target key start
LH: loop header
LB: loop body
LE: loop exit
PB: predicated region body
PF: predicated region fallthrough
CT: control target
= control target key end

     0   :  { %s1370_s15 = smov 0   ;;  %s1548_s0 = inlined_call_operand.vmem [shape: bf16[256,256], index: 0, kind: input, shape index: {}]   ;;  %s1549_s1 = inlined_call_operand.vmem [shape: bf16[256,128], index: 1, kind: input, shape index: {}]   ;;  %s1550_s2 = inlined_call_operand.vmem [shape: bf16[128,256], index: 2, kind: input, shape index: {}]   ;;  %s1551_s3 = inlined_call_operand.vmem [shape: f32[256,128], index: 3, kind: input, shape index: {}]   ;;  %s1552_s4 = inlined_call_operand.vmem [shape: bf16[256,128], index: 4, kind: output, shape index: {}]  }
   0x1 LB: > { %s1025_s16 = sadd.s32 4294967295, %s1342_s15   ;;  %p1029_p0 = scmp.ge.s32.totalorder %s1342_s15, 1  ;;  %s1342_s15 = sphi %s1370_s15, %s14_s15  }
   0x2   : > { %p175_p1 = scmp.lt.s32.totalorder %s1342_s15, 3 }
   0x4   : > { %p176_p2 = pnand %p1029_p0, %p175_p1 }
   0x5   : > { %v1240_v0 = vld [vmem:[%s1549_s1 + $0x40] sm:$0xff] (!%p176_p2)   ;;  %s1030_s19 = sshll.u32 (!%p176_p2), %s1025_s16, 4  ;;  %v1242_v2 = vld [vmem:[%s1549_s1 + $0x48] sm:$0xff] (!%p176_p2)   ;;  %v1244_v4 = vld [vmem:[%s1549_s1 + $0x50] sm:$0xff] (!%p176_p2)   ;;  %v1344_v48 = vmov (!%p176_p2), 0  }
   0x6   : > { %179 = sbr.rel (%p176_p2) target bundleno = 550 (0x226), region = 36  ;;  %v1241_v1 = vld [vmem:[%s1549_s1] sm:$0xff] (!%p176_p2)   ;;  %1167 = vmatprep.subr.bf16.mxu0 (!%p176_p2), %v1240_v0  ;;  %v1243_v3 = vld [vmem:[%s1549_s1 + $0x8] sm:$0xff] (!%p176_p2)   ;;  %p208_p3 = scmp.lt.s32.totalorder (!%p176_p2), %s1030_s19, 31  ;;  %v1245_v5 = vld [vmem:[%s1549_s1 + $0x10] sm:$0xff] (!%p176_p2)   ;;  %684 = vmatprep.mubr.bf16.mxu1 (!%p176_p2), %v1344_v48 }
   0x7   : > { %1168 = vmatpush3.bf16.msra.mxu0 (!%p176_p2), %v1241_v1  ;;  %v1246_v6 = vld [vmem:[%s1549_s1 + $0x58] sm:$0xff] (!%p176_p2)   ;;  %v1248_v8 = vld [vmem:[%s1549_s1 + $0x60] sm:$0xff] (!%p176_p2)   ;;  %v1250_v10 = vld [vmem:[%s1549_s1 + $0x68] sm:$0xff] (!%p176_p2)  }
   0x8   : > { %1169 = vmatprep.subr.bf16.mxu0 (!%p176_p2), %v1242_v2  ;;  %v1247_v7 = vld [vmem:[%s1549_s1 + $0x18] sm:$0xff] (!%p176_p2)   ;;  %v1249_v9 = vld [vmem:[%s1549_s1 + $0x20] sm:$0xff] (!%p176_p2)   ;;  %v1251_v12 = vld [vmem:[%s1549_s1 + $0x28] sm:$0xff] (!%p176_p2)  }
   0x9   : > { %v1252_v13 = vld [vmem:[%s1549_s1 + $0x70] sm:$0xff] (!%p176_p2)   ;;  %v1254_v15 = vld [vmem:[%s1549_s1 + $0x78] sm:$0xff] (!%p176_p2)   ;;  %v1280_v17 = vld [vmem:[%s1550_s2 + $0x4] ss:$8 sps:$4 sm:$0xff] (!%p176_p2)  }
   0xa   : > { %v1253_v14 = vld [vmem:[%s1549_s1 + $0x30] sm:$0xff] (!%p176_p2)   ;;  %v1255_v16 = vld [vmem:[%s1549_s1 + $0x38] sm:$0xff] (!%p176_p2)   ;;  %v1282_v18 = vld [vmem:[%s1550_s2] ss:$8 sps:$4 sm:$0xff] (!%p176_p2)   ;;  %652 = vmatprep.subr.bf16.mxu1 (!%p176_p2), %v1280_v17 }
   0xb   : > { %1170 = vmatpush3.bf16.msra.mxu0 (!%p176_p2), %v1243_v3  ;;  %v1283_v19 = vld [vmem:[%s1550_s2 + $0x14] ss:$8 sps:$4 sm:$0xff] (!%p176_p2)   ;;  %653 = vmatpush1.bf16.msra.mxu1 (!%p176_p2), %v1282_v18  ;;  %v1285_v21 = vld [vmem:[%s1550_s2 + $0x10] ss:$8 sps:$4 sm:$0xff] (!%p176_p2)   ;;  %v1286_v23 = vld [vmem:[%s1550_s2 + $0x24] ss:$8 sps:$4 sm:$0xff] (!%p176_p2)  }
   0xc   : > { %1171 = vmatprep.subr.bf16.mxu0 (!%p176_p2), %v1244_v4  ;;  %654 = vmatprep.subr.bf16.mxu1 (!%p176_p2), %v1283_v19  ;;  %v1288_v24 = vld [vmem:[%s1550_s2 + $0x20] ss:$8 sps:$4 sm:$0xff] (!%p176_p2)   ;;  %v1289_v25 = vld [vmem:[%s1550_s2 + $0x34] ss:$8 sps:$4 sm:$0xff] (!%p176_p2)   ;;  %v1291_v27 = vld [vmem:[%s1550_s2 + $0x30] ss:$8 sps:$4 sm:$0xff] (!%p176_p2)  }
   0xd   : > { %s1554_s19 = smov (!%p208_p3, %s1030_s19), 31  ;;  %v1292_v29 = vld [vmem:[%s1550_s2 + $0x44] ss:$8 sps:$4 sm:$0xff]   ;;  %v1294_v30 = vld [vmem:[%s1550_s2 + $0x40] ss:$8 sps:$4 sm:$0xff]  }
   0xe   : > { %s1103_s8 = sshll.u32 %s1554_s19, 3  ;;  %v1295_v31 = vld [vmem:[%s1550_s2 + $0x54] ss:$8 sps:$4 sm:$0xff]   ;;  %v1297_v33 = vld [vmem:[%s1550_s2 + $0x50] ss:$8 sps:$4 sm:$0xff]  }
   0xf   : > { %1172 = vmatpush3.bf16.msra.mxu0 %v1245_v5  ;;  %s1413_s13 = scalar_lea.vmem %s1548_s0, %s1103_s8  ;;  %655 = vmatpush1.bf16.msra.mxu1 %v1285_v21  ;;  %v1298_v44 = vld [vmem:[%s1550_s2 + $0x64] ss:$8 sps:$4 sm:$0xff]   ;;  %v1300_v45 = vld [vmem:[%s1550_s2 + $0x60] ss:$8 sps:$4 sm:$0xff]   ;;  %v1301_v46 = vld [vmem:[%s1550_s2 + $0x74] ss:$8 sps:$4 sm:$0xff]   ;;  %s1513_s18 = scalar_lea.vmem %s1551_s3, %s1103_s8 }
  0x10   : > { %1173 = vmatprep.subr.bf16.mxu0 %v1246_v6  ;;  %v1258_v11 = vld [vmem:[%s1413_s13 + $0x4] ss:$8 sps:$4 sm:$0xff]   ;;  %v1256_v20 = vld [vmem:[%s1413_s13] ss:$8 sps:$4 sm:$0xff]   ;;  %v1259_v22 = vld [vmem:[%s1413_s13 + $0x14] ss:$8 sps:$4 sm:$0xff]   ;;  %656 = vmatprep.subr.bf16.mxu1 %v1286_v23 }
  0x11   : > { %483 = vmatprep.mubr.bf16.mxu0 %v1258_v11  ;;  %v1261_v26 = vld [vmem:[%s1413_s13 + $0x10] ss:$8 sps:$4 sm:$0xff]   ;;  %v1262_v28 = vld [vmem:[%s1413_s13 + $0x24] ss:$8 sps:$4 sm:$0xff]   ;;  %v1264_v32 = vld [vmem:[%s1413_s13 + $0x20] ss:$8 sps:$4 sm:$0xff]  }
  0x12   : > { %v1265_v34 = vld [vmem:[%s1413_s13 + $0x34] ss:$8 sps:$4 sm:$0xff]   ;;  %v1267_v35 = vld [vmem:[%s1413_s13 + $0x30] ss:$8 sps:$4 sm:$0xff]   ;;  %v1268_v36 = vld [vmem:[%s1413_s13 + $0x44] ss:$8 sps:$4 sm:$0xff]  }
  0x13   : > { %1174 = vmatpush3.bf16.msra.mxu0 %v1247_v7  ;;  %657 = vmatpush1.bf16.msra.mxu1 %v1288_v24  ;;  %v1270_v37 = vld [vmem:[%s1413_s13 + $0x40] ss:$8 sps:$4 sm:$0xff]   ;;  %v1271_v38 = vld [vmem:[%s1413_s13 + $0x54] ss:$8 sps:$4 sm:$0xff]   ;;  %v1273_v39 = vld [vmem:[%s1413_s13 + $0x50] ss:$8 sps:$4 sm:$0xff]  }
  0x14   : > { %1175 = vmatprep.subr.bf16.mxu0 %v1248_v8  ;;  %658 = vmatprep.subr.bf16.mxu1 %v1289_v25  ;;  %v1274_v40 = vld [vmem:[%s1413_s13 + $0x64] ss:$8 sps:$4 sm:$0xff]   ;;  %v1276_v41 = vld [vmem:[%s1413_s13 + $0x60] ss:$8 sps:$4 sm:$0xff]   ;;  %v1277_v42 = vld [vmem:[%s1413_s13 + $0x74] ss:$8 sps:$4 sm:$0xff]  }
  0x15   : > { %v1279_v43 = vld [vmem:[%s1413_s13 + $0x70] ss:$8 sps:$4 sm:$0xff]   ;;  %s1036_s8 = sshll.u32 %s1554_s19, 2 }
  0x16   : > { %v1303_v47 = vld [vmem:[%s1550_s2 + $0x70] ss:$8 sps:$4 sm:$0xff]   ;;  %s1521_s22 = scalar_lea.vmem %s1552_s4, %s1036_s8 }
  0x17   : > { %1176 = vmatpush3.bf16.msra.mxu0 %v1249_v9  ;;  %659 = vmatpush1.bf16.msra.mxu1 %v1291_v27 }
  0x18   : > { %1177 = vmatprep.subr.bf16.mxu0 %v1250_v10  ;;  %660 = vmatprep.subr.bf16.mxu1 %v1292_v29 }
  0x1b   : > { %1178 = vmatpush3.bf16.msra.mxu0 %v1251_v12  ;;  %661 = vmatpush1.bf16.msra.mxu1 %v1294_v30 }
  0x1c   : > { %1179 = vmatprep.subr.bf16.mxu0 %v1252_v13  ;;  %662 = vmatprep.subr.bf16.mxu1 %v1295_v31 }
  0x1f   : > { %1180 = vmatpush3.bf16.msra.mxu0 %v1253_v14  ;;  %663 = vmatpush1.bf16.msra.mxu1 %v1297_v33 }
  0x20   : > { %1181 = vmatprep.subr.bf16.mxu0 %v1254_v15  ;;  %664 = vmatprep.subr.bf16.mxu1 %v1298_v44 }
  0x23   : > { %1182 = vmatpush3.bf16.msra.mxu0 %v1255_v16  ;;  %665 = vmatpush1.bf16.msra.mxu1 %v1300_v45 }
  0x24   : > { %666 = vmatprep.subr.bf16.mxu1 %v1301_v46 }
  0x26   : > { %484 = vmatmul.mubr.bf16.vlgmr.msra.gmra.mrb[0].mxu0 %v1256_v20 }
  0x27   : > { %491 = vmatprep.mubr.bf16.mxu0 %v1259_v22  ;;  %667 = vmatpush1.bf16.msra.mxu1 %v1303_v47 }
  0x2e   : > { %492 = vmatmul.mubr.bf16.gmra.mrb[4].mxu0 %v1261_v26 }
  0x2f   : > { %499 = vmatprep.mubr.bf16.mxu0 %v1262_v28 }
  0x36   : > { %500 = vmatmul.mubr.bf16.gmra.mrb[8].mxu0 %v1264_v32 }
  0x37   : > { %507 = vmatprep.mubr.bf16.mxu0 %v1265_v34 }
  0x3e   : > { %508 = vmatmul.mubr.bf16.gmra.mrb[12].mxu0 %v1267_v35 }
  0x3f   : > { %515 = vmatprep.mubr.bf16.mxu0 %v1268_v36 }
  0x46   : > { %516 = vmatmul.mubr.bf16.gmra.mrb[16].mxu0 %v1270_v37 }
  0x47   : > { %523 = vmatprep.mubr.bf16.mxu0 %v1271_v38 }
  0x4e   : > { %524 = vmatmul.mubr.bf16.gmra.mrb[20].mxu0 %v1273_v39 }
  0x4f   : > { %531 = vmatprep.mubr.bf16.mxu0 %v1274_v40 }
  0x56   : > { %532 = vmatmul.mubr.bf16.gmra.mrb[24].mxu0 %v1276_v41 }
  0x57   : > { %539 = vmatprep.mubr.bf16.mxu0 %v1277_v42 }
  0x5e   : > { %540 = vmatmul.mubr.bf16.gmra.mrb[28].mxu0 %v1279_v43 }
  0xf9   : > { %v1183_v49 = vpop.f32.mrb[0].mxu0 }
  0xfa   : > { %v1184_v50 = vpop.f32.mrb[1].mxu0 }
  0xfb   : > { %v1185_v51 = vadd.f32 %v1184_v50, %v1183_v49  ;;  %v1186_v52 = vpop.f32.mrb[2].mxu0 }
  0xfc   : > { %v1187_v53 = vpop.f32.mrb[3].mxu0 }
  0xfd   : > { %v1188_v54 = vadd.f32 %v1187_v53, %v1186_v52 }
  0xff   : > { %v548_v55 = vpack.c.bf16 %v1188_v54, %v1185_v51 }
 0x101   : > { %v1189_v56 = vpop.f32.mrb[4].mxu0  ;;  %685 = vmatmul.mubr.bf16.vlgmr.msra.gmra.mrb[0].mxu1 %v548_v55 }
 0x102   : > { %v1190_v57 = vpop.f32.mrb[5].mxu0  ;;  %694 = vmatprep.mubr.bf16.mxu1 %v1344_v48 }
 0x103   : > { %v1191_v58 = vadd.f32 %v1190_v57, %v1189_v56  ;;  %v1192_v59 = vpop.f32.mrb[6].mxu0  ;;  %v797_v56 = vld [vmem:[%s1513_s18] sm:$0xff] }
 0x104   : > { %v1193_v60 = vpop.f32.mrb[7].mxu0 }
 0x105   : > { %v1194_v61 = vadd.f32 %v1193_v60, %v1192_v59  ;;  %v798_v59 = vld [vmem:[%s1513_s18 + $0x8] sm:$0xff] }
 0x107   : > { %v549_v62 = vpack.c.bf16 %v1194_v61, %v1191_v58 }
 0x109   : > { %v1195_v63 = vpop.f32.mrb[8].mxu0  ;;  %695 = vmatmul.mubr.bf16.gmra.mrb[4].mxu1 %v549_v62 }
 0x10a   : > { %v1196_v0 = vpop.f32.mrb[9].mxu0  ;;  %704 = vmatprep.mubr.bf16.mxu1 %v1344_v48 }
 0x10b   : > { %v1197_v1 = vadd.f32 %v1196_v0, %v1195_v63  ;;  %v1198_v2 = vpop.f32.mrb[10].mxu0 }
 0x10c   : > { %v1199_v3 = vpop.f32.mrb[11].mxu0 }
 0x10d   : > { %v1200_v4 = vadd.f32 %v1199_v3, %v1198_v2 }
 0x10f   : > { %v550_v5 = vpack.c.bf16 %v1200_v4, %v1197_v1 }
 0x111   : > { %v1201_v6 = vpop.f32.mrb[12].mxu0  ;;  %705 = vmatmul.mubr.bf16.gmra.mrb[8].mxu1 %v550_v5 }
 0x112   : > { %v1202_v7 = vpop.f32.mrb[13].mxu0  ;;  %714 = vmatprep.mubr.bf16.mxu1 %v1344_v48 }
 0x113   : > { %v1203_v8 = vadd.f32 %v1202_v7, %v1201_v6  ;;  %v1204_v9 = vpop.f32.mrb[14].mxu0 }
 0x114   : > { %v1205_v10 = vpop.f32.mrb[15].mxu0 }
 0x115   : > { %v1206_v11 = vadd.f32 %v1205_v10, %v1204_v9  ;;  %v799_v10 = vld [vmem:[%s1513_s18 + $0x10] sm:$0xff] }
 0x117   : > { %v551_v12 = vpack.c.bf16 %v1206_v11, %v1203_v8 }
 0x119   : > { %v1207_v13 = vpop.f32.mrb[16].mxu0  ;;  %715 = vmatmul.mubr.bf16.gmra.mrb[12].mxu1 %v551_v12 }
 0x11a   : > { %v1208_v14 = vpop.f32.mrb[17].mxu0  ;;  %724 = vmatprep.mubr.bf16.mxu1 %v1344_v48 }
 0x11b   : > { %v1209_v15 = vadd.f32 %v1208_v14, %v1207_v13  ;;  %v1210_v16 = vpop.f32.mrb[18].mxu0  ;;  %v800_v14 = vld [vmem:[%s1513_s18 + $0x18] sm:$0xff] }
 0x11c   : > { %v1211_v17 = vpop.f32.mrb[19].mxu0 }
 0x11d   : > { %v1212_v18 = vadd.f32 %v1211_v17, %v1210_v16 }
 0x11f   : > { %v552_v19 = vpack.c.bf16 %v1212_v18, %v1209_v15 }
 0x121   : > { %v1213_v20 = vpop.f32.mrb[20].mxu0  ;;  %725 = vmatmul.mubr.bf16.gmra.mrb[16].mxu1 %v552_v19 }
 0x122   : > { %v1214_v21 = vpop.f32.mrb[21].mxu0  ;;  %734 = vmatprep.mubr.bf16.mxu1 %v1344_v48 }
 0x123   : > { %v1215_v22 = vadd.f32 %v1214_v21, %v1213_v20  ;;  %v1216_v23 = vpop.f32.mrb[22].mxu0 }
 0x124   : > { %v1217_v24 = vpop.f32.mrb[23].mxu0 }
 0x125   : > { %v1218_v25 = vadd.f32 %v1217_v24, %v1216_v23 }
 0x127   : > { %v553_v26 = vpack.c.bf16 %v1218_v25, %v1215_v22 }
 0x129   : > { %v1219_v27 = vpop.f32.mrb[24].mxu0  ;;  %735 = vmatmul.mubr.bf16.gmra.mrb[20].mxu1 %v553_v26 }
 0x12a   : > { %v1220_v28 = vpop.f32.mrb[25].mxu0  ;;  %744 = vmatprep.mubr.bf16.mxu1 %v1344_v48 }
 0x12b   : > { %v1221_v29 = vadd.f32 %v1220_v28, %v1219_v27  ;;  %v1222_v30 = vpop.f32.mrb[26].mxu0 }
 0x12c   : > { %v1223_v31 = vpop.f32.mrb[27].mxu0 }
 0x12d   : > { %v1224_v32 = vadd.f32 %v1223_v31, %v1222_v30 }
 0x12f   : > { %v554_v33 = vpack.c.bf16 %v1224_v32, %v1221_v29  ;;  %v801_v29 = vld [vmem:[%s1513_s18 + $0x20] sm:$0xff] }
 0x131   : > { %v1225_v34 = vpop.f32.mrb[28].mxu0  ;;  %745 = vmatmul.mubr.bf16.gmra.mrb[24].mxu1 %v554_v33  ;;  %v802_v33 = vld [vmem:[%s1513_s18 + $0x28] sm:$0xff] }
 0x132   : > { %v1226_v35 = vpop.f32.mrb[29].mxu0  ;;  %754 = vmatprep.mubr.bf16.mxu1 %v1344_v48 }
 0x133   : > { %v1227_v36 = vadd.f32 %v1226_v35, %v1225_v34  ;;  %v1228_v37 = vpop.f32.mrb[30].mxu0 }
 0x134   : > { %v1229_v38 = vpop.f32.mrb[31].mxu0 }
 0x135   : > { %v1230_v39 = vadd.f32 %v1229_v38, %v1228_v37 }
 0x137   : > { %v555_v40 = vpack.c.bf16 %v1230_v39, %v1227_v36 }
 0x139   : > { %755 = vmatmul.mubr.bf16.gmra.mrb[28].mxu1 %v555_v40 }
 0x1d4   : > { %v686_v41 = vpop.f32.mrb[0].mxu1 }
 0x1d5   : > { %v688_v42 = vpop.f32.mrb[1].mxu1  ;;  %v765_v61 = vmax.f32 %v686_v41, 0.0 }
 0x1d6   : > { %v781_v43 = vmax.f32 %v688_v42, 0.0  ;;  %v690_v44 = vpop.f32.mrb[2].mxu1 }
 0x1d7   : > { %v692_v45 = vpop.f32.mrb[3].mxu1  ;;  %v766_v4 = vmax.f32 %v690_v44, 0.0 }
 0x1d8   : > { %v813_v46 = vmul.f32 1.442695, %v781_v43  ;;  %v782_v47 = vmax.f32 %v692_v45, 0.0 }
 0x1da   : > { %1304 = vpow2.f32 %v813_v46  ;;  %v815_v49 = vmul.f32 1.442695, %v782_v47 }
 0x1dc   : > { %1306 = vpow2.f32 %v815_v49  ;;  %v696_v50 = vpop.f32.mrb[4].mxu1  ;;  %v803_v49 = vld [vmem:[%s1513_s18 + $0x30] sm:$0xff] }
 0x1dd   : > { %v698_v51 = vpop.f32.mrb[5].mxu1  ;;  %v767_v16 = vmax.f32 %v696_v50, 0.0 }
 0x1de   : > { %v783_v48 = vmax.f32 %v698_v51, 0.0  ;;  %v700_v52 = vpop.f32.mrb[6].mxu1 }
 0x1df   : > { %v702_v53 = vpop.f32.mrb[7].mxu1  ;;  %v768_v23 = vmax.f32 %v700_v52, 0.0  ;;  %v804_v52 = vld [vmem:[%s1513_s18 + $0x38] sm:$0xff] }
 0x1e0   : > { %v817_v54 = vmul.f32 1.442695, %v783_v48  ;;  %v784_v55 = vmax.f32 %v702_v53, 0.0 }
 0x1e2   : > { %1308 = vpow2.f32 %v817_v54  ;;  %v819_v57 = vmul.f32 1.442695, %v784_v55 }
 0x1e4   : > { %v1305_v58 = vpop.eup %1304  ;;  %1310 = vpow2.f32 %v819_v57  ;;  %v706_v60 = vpop.f32.mrb[8].mxu1 }
 0x1e5   : > { %v845_v62 = vmul.f32 %v1305_v58, %v797_v56  ;;  %v708_v63 = vpop.f32.mrb[9].mxu1  ;;  %v769_v35 = vmax.f32 %v706_v60, 0.0 }
 0x1e6   : > { %v1307_v0 = vpop.eup %1306  ;;  %v785_v1 = vmax.f32 %v708_v63, 0.0  ;;  %v710_v2 = vpop.f32.mrb[10].mxu1 }
 0x1e7   : > { %v861_v3 = vadd.f32 %v845_v62, %v765_v61  ;;  %v846_v5 = vmul.f32 %v1307_v0, %v798_v59  ;;  %v712_v6 = vpop.f32.mrb[11].mxu1  ;;  %v770_v42 = vmax.f32 %v710_v2, 0.0 }
 0x1e8   : > { %v821_v7 = vmul.f32 1.442695, %v785_v1  ;;  %v786_v8 = vmax.f32 %v712_v6, 0.0 }
 0x1e9   : > { %v862_v9 = vadd.f32 %v846_v5, %v766_v4 }
 0x1ea   : > { %1312 = vpow2.f32 %v821_v7  ;;  %v823_v11 = vmul.f32 1.442695, %v786_v8  ;;  %v806_v7 = vld [vmem:[%s1513_s18 + $0x48] sm:$0xff] }
 0x1eb   : > { %v1123_v12 = vpack.c.bf16 %v862_v9, %v861_v3  ;;  %v805_v3 = vld [vmem:[%s1513_s18 + $0x40] sm:$0xff] }
 0x1ec   : > { %v1309_v13 = vpop.eup %1308  ;;  %1314 = vpow2.f32 %v823_v11  ;;  %v716_v15 = vpop.f32.mrb[12].mxu1 }
 0x1ed   : > { %1124 = vst [vmem:[%s1521_s22] sm:$0xff] %v1123_v12   ;;  %v847_v17 = vmul.f32 %v1309_v13, %v799_v10  ;;  %v718_v18 = vpop.f32.mrb[13].mxu1  ;;  %v771_v54 = vmax.f32 %v716_v15, 0.0 }
 0x1ee   : > { %v1311_v19 = vpop.eup %1310  ;;  %v787_v20 = vmax.f32 %v718_v18, 0.0  ;;  %v720_v21 = vpop.f32.mrb[14].mxu1 }
 0x1ef   : > { %v863_v22 = vadd.f32 %v847_v17, %v767_v16  ;;  %v848_v24 = vmul.f32 %v1311_v19, %v800_v14  ;;  %v722_v25 = vpop.f32.mrb[15].mxu1  ;;  %v772_v61 = vmax.f32 %v720_v21, 0.0 }
 0x1f0   : > { %v825_v26 = vmul.f32 1.442695, %v787_v20  ;;  %v788_v27 = vmax.f32 %v722_v25, 0.0 }
 0x1f1   : > { %v864_v28 = vadd.f32 %v848_v24, %v768_v23 }
 0x1f2   : > { %1316 = vpow2.f32 %v825_v26  ;;  %v827_v30 = vmul.f32 1.442695, %v788_v27  ;;  %v808_v26 = vld [vmem:[%s1513_s18 + $0x58] sm:$0xff] }
 0x1f3   : > { %v1128_v31 = vpack.c.bf16 %v864_v28, %v863_v22  ;;  %v807_v22 = vld [vmem:[%s1513_s18 + $0x50] sm:$0xff] }
 0x1f4   : > { %v1313_v32 = vpop.eup %1312  ;;  %1318 = vpow2.f32 %v827_v30  ;;  %v726_v34 = vpop.f32.mrb[16].mxu1 }
 0x1f5   : > { %1160 = vst [vmem:[%s1521_s22 + $0x8] sm:$0xff] %v1128_v31   ;;  %v849_v36 = vmul.f32 %v1313_v32, %v801_v29  ;;  %v728_v37 = vpop.f32.mrb[17].mxu1  ;;  %v773_v9 = vmax.f32 %v726_v34, 0.0 }
 0x1f6   : > { %v1315_v38 = vpop.eup %1314  ;;  %v789_v39 = vmax.f32 %v728_v37, 0.0  ;;  %v730_v40 = vpop.f32.mrb[18].mxu1 }
 0x1f7   : > { %v865_v41 = vadd.f32 %v849_v36, %v769_v35  ;;  %v850_v43 = vmul.f32 %v1315_v38, %v802_v33  ;;  %v732_v44 = vpop.f32.mrb[19].mxu1  ;;  %v774_v16 = vmax.f32 %v730_v40, 0.0 }
 0x1f8   : > { %v829_v45 = vmul.f32 1.442695, %v789_v39  ;;  %v790_v46 = vmax.f32 %v732_v44, 0.0 }
 0x1f9   : > { %v866_v47 = vadd.f32 %v850_v43, %v770_v42 }
 0x1fa   : > { %1320 = vpow2.f32 %v829_v45  ;;  %v831_v50 = vmul.f32 1.442695, %v790_v46  ;;  %v810_v45 = vld [vmem:[%s1513_s18 + $0x68] sm:$0xff] }
 0x1fb   : > { %v1133_v51 = vpack.c.bf16 %v866_v47, %v865_v41  ;;  %v809_v41 = vld [vmem:[%s1513_s18 + $0x60] sm:$0xff] }
 0x1fc   : > { %v1317_v48 = vpop.eup %1316  ;;  %1322 = vpow2.f32 %v831_v50  ;;  %v736_v53 = vpop.f32.mrb[20].mxu1 }
 0x1fd   : > { %1161 = vst [vmem:[%s1521_s22 + $0x10] sm:$0xff] %v1133_v51   ;;  %v851_v55 = vmul.f32 %v1317_v48, %v803_v49  ;;  %v738_v56 = vpop.f32.mrb[21].mxu1  ;;  %v775_v28 = vmax.f32 %v736_v53, 0.0  ;;  %v811_v53 = vld [vmem:[%s1513_s18 + $0x70] sm:$0xff] }
 0x1fe   : > { %v1319_v57 = vpop.eup %1318  ;;  %v791_v58 = vmax.f32 %v738_v56, 0.0  ;;  %v740_v59 = vpop.f32.mrb[22].mxu1  ;;  %v812_v56 = vld [vmem:[%s1513_s18 + $0x78] sm:$0xff] }
 0x1ff   : > { %v867_v60 = vadd.f32 %v851_v55, %v771_v54  ;;  %v852_v62 = vmul.f32 %v1319_v57, %v804_v52  ;;  %v742_v63 = vpop.f32.mrb[23].mxu1  ;;  %v776_v35 = vmax.f32 %v740_v59, 0.0 }
 0x200   : > { %v833_v0 = vmul.f32 1.442695, %v791_v58  ;;  %v792_v1 = vmax.f32 %v742_v63, 0.0 }
 0x201   : > { %v868_v2 = vadd.f32 %v852_v62, %v772_v61 }
 0x202   : > { %1324 = vpow2.f32 %v833_v0  ;;  %v835_v4 = vmul.f32 1.442695, %v792_v1 }
 0x203   : > { %v1138_v5 = vpack.c.bf16 %v868_v2, %v867_v60 }
 0x204   : > { %v1321_v6 = vpop.eup %1320  ;;  %1326 = vpow2.f32 %v835_v4  ;;  %v746_v8 = vpop.f32.mrb[24].mxu1 }
 0x205   : > { %1162 = vst [vmem:[%s1521_s22 + $0x18] sm:$0xff] %v1138_v5   ;;  %v853_v10 = vmul.f32 %v1321_v6, %v805_v3  ;;  %v748_v11 = vpop.f32.mrb[25].mxu1  ;;  %v777_v46 = vmax.f32 %v746_v8, 0.0 }
 0x206   : > { %v1323_v12 = vpop.eup %1322  ;;  %v793_v13 = vmax.f32 %v748_v11, 0.0  ;;  %v750_v14 = vpop.f32.mrb[26].mxu1 }
 0x207   : > { %v869_v15 = vadd.f32 %v853_v10, %v773_v9  ;;  %v854_v17 = vmul.f32 %v1323_v12, %v806_v7  ;;  %v752_v18 = vpop.f32.mrb[27].mxu1  ;;  %v778_v51 = vmax.f32 %v750_v14, 0.0 }
 0x208   : > { %v837_v19 = vmul.f32 1.442695, %v793_v13  ;;  %v794_v20 = vmax.f32 %v752_v18, 0.0 }
 0x209   : > { %v870_v21 = vadd.f32 %v854_v17, %v774_v16 }
 0x20a   : > { %1328 = vpow2.f32 %v837_v19  ;;  %v839_v23 = vmul.f32 1.442695, %v794_v20 }
 0x20b   : > { %v1143_v24 = vpack.c.bf16 %v870_v21, %v869_v15 }
 0x20c   : > { %v1325_v25 = vpop.eup %1324  ;;  %1330 = vpow2.f32 %v839_v23  ;;  %v756_v27 = vpop.f32.mrb[28].mxu1 }
 0x20d   : > { %1163 = vst [vmem:[%s1521_s22 + $0x20] sm:$0xff] %v1143_v24   ;;  %v855_v29 = vmul.f32 %v1325_v25, %v807_v22  ;;  %v758_v30 = vpop.f32.mrb[29].mxu1  ;;  %v779_v57 = vmax.f32 %v756_v27, 0.0 }
 0x20e   : > { %v1327_v31 = vpop.eup %1326  ;;  %v795_v32 = vmax.f32 %v758_v30, 0.0  ;;  %v760_v33 = vpop.f32.mrb[30].mxu1 }
 0x20f   : > { %v871_v34 = vadd.f32 %v855_v29, %v775_v28  ;;  %v856_v36 = vmul.f32 %v1327_v31, %v808_v26  ;;  %v762_v37 = vpop.f32.mrb[31].mxu1  ;;  %v780_v61 = vmax.f32 %v760_v33, 0.0 }
 0x210   : > { %v841_v38 = vmul.f32 1.442695, %v795_v32  ;;  %v796_v39 = vmax.f32 %v762_v37, 0.0 }
 0x211   : > { %v872_v40 = vadd.f32 %v856_v36, %v776_v35 }
 0x212   : > { %1332 = vpow2.f32 %v841_v38  ;;  %v843_v42 = vmul.f32 1.442695, %v796_v39 }
 0x213   : > { %v1148_v43 = vpack.c.bf16 %v872_v40, %v871_v34 }
 0x214   : > { %v1329_v44 = vpop.eup %1328  ;;  %1334 = vpow2.f32 %v843_v42 }
 0x215   : > { %1164 = vst [vmem:[%s1521_s22 + $0x28] sm:$0xff] %v1148_v43   ;;  %v857_v47 = vmul.f32 %v1329_v44, %v809_v41 }
 0x216   : > { %v1331_v49 = vpop.eup %1330 }
 0x217   : > { %v873_v50 = vadd.f32 %v857_v47, %v777_v46  ;;  %v858_v48 = vmul.f32 %v1331_v49, %v810_v45 }
 0x219   : > { %v874_v52 = vadd.f32 %v858_v48, %v778_v51 }
 0x21b   : > { %v1153_v54 = vpack.c.bf16 %v874_v52, %v873_v50 }
 0x21c   : > { %v1333_v55 = vpop.eup %1332 }
 0x21d   : > { %1165 = vst [vmem:[%s1521_s22 + $0x30] sm:$0xff] %v1153_v54   ;;  %v859_v58 = vmul.f32 %v1333_v55, %v811_v53 }
 0x21e   : > { %v1335_v59 = vpop.eup %1334 }
 0x21f   : > { %v875_v60 = vadd.f32 %v859_v58, %v779_v57  ;;  %v860_v62 = vmul.f32 %v1335_v59, %v812_v56 }
 0x221   : > { %v876_v63 = vadd.f32 %v860_v62, %v780_v61 }
 0x223   : > { %v1158_v0 = vpack.c.bf16 %v876_v63, %v875_v60 }
 0x225   : > { %1166 = vst [vmem:[%s1521_s22 + $0x38] sm:$0xff] %v1158_v0  }
 0x226 PF: > { %s14_s15 = sadd.s32 1, %s1342_s15  }
 0x227   : > { %p11_p4 = scmp.ge.s32.totalorder %s14_s15, 4  }
 0x229   :  { %13 = sbr.rel (!%p11_p4) target bundleno = 1 (0x1), region = 69 }

// kernel: vgae_forward.7
= control target key start
LH: loop header
LB: loop body
LE: loop exit
PB: predicated region body
PF: predicated region fallthrough
CT: control target
= control target key end

     0   :  { %11 = vsyncpa [#allocation3], 0  ;;  %s1992_s0 = inlined_call_operand.vmem [shape: bf16[256,256], index: 0, kind: input, shape index: {}]   ;;  %s1993_s1 = inlined_call_operand.vmem [shape: bf16[256,128], index: 1, kind: input, shape index: {}, may-alias: {1,2}]   ;;  %s1994_s2 = inlined_call_operand.vmem [shape: bf16[256,128], index: 2, kind: input, shape index: {}, may-alias: {1,2}]   ;;  %s1995_s3 = inlined_call_operand.vmem [shape: bf16[128,128], index: 3, kind: input, shape index: {}]   ;;  %s1996_s4 = inlined_call_operand.vmem [shape: f32[256,128], index: 4, kind: output, shape index: {0}]   ;;  %s1997_s5 = inlined_call_operand.hbm [shape: f32[256,256], index: 5, kind: output, shape index: {1}]  }
   0x1   :  { %13 = vsyncpa [#allocation3 + $0x1], 0  ;;  %s1671_s18 = smov 0   ;;  %s1673_s19 = smov 0  }
   0x2   :  { %s1675_s20 = smov 0   ;;  %s1677_s21 = smov 0  }
   0x3 LB: > { %s1692_s22 = sadd.s32 4294967295, %s1636_s21   ;;  %s1232_s23 = sadd.s32 4294967294, %s1636_s21   ;;  %s1636_s21 = sphi %s1677_s21, %s2003_s21   ;;  %s1632_s20 = sphi %s1675_s20, %s2002_s20   ;;  %s1628_s19 = sphi %s1673_s19, %s2001_s19   ;;  %s1624_s18 = sphi %s1671_s18, %s2000_s18  }
   0x4   : > { %s1696_s24 = sadd.s32 1, %s1636_s21   ;;  %s146_s25 = sadd.s32 1, %s1632_s20 }
   0x5   : > { %s143_s26 = ssub.s32 %s1636_s21, %s1696_s24  ;;  %p156_p0 = scmp.ne.s32.totalorder %s1632_s20, %s1628_s19 }
   0x6   : > { %p144_p1 = scmp.eq.s32.totalorder %s143_s26, 0  ;;  %p157_p2 = scmp.eq.s32.totalorder %s1692_s22, 1 }
   0x7   : > { %p162_p3 = scmp.ne.s32.totalorder %s1628_s19, %s1624_s18  ;;  %p163_p4 = scmp.eq.s32.totalorder %s1232_s23, 1 }
   0x8   : > { %s1707_s27 = scalar_select %p144_p1, %s1632_s20, %s146_s25  }
   0x9   : > { %p1709_p5 = por %p157_p2, %p156_p0  ;;  %p1713_p6 = por %p163_p4, %p162_p3 }
   0xa   : > { %p1235_p7 = scmp.ge.s32.totalorder %s1636_s21, 1  ;;  %p206_p8 = scmp.lt.s32.totalorder %s1636_s21, 3 }
   0xc   : > { %p207_p9 = pnand %p1235_p7, %p206_p8 }
   0xd   : > { %v1502_v0 = vld [vmem:[%s1993_s1 + $0x40] sm:$0xff] (!%p207_p9)   ;;  %s1237_s7 = sshll.u32 (!%p207_p9), %s1692_s22, 4  ;;  %v1504_v2 = vld [vmem:[%s1993_s1 + $0x48] sm:$0xff] (!%p207_p9)   ;;  %v1506_v4 = vld [vmem:[%s1993_s1 + $0x50] sm:$0xff] (!%p207_p9)   ;;  %s242_s13 = sand.u32 (!%p207_p9), 1, %s1628_s19  }
   0xe   : > { %210 = sbr.rel (%p207_p9) target bundleno = 537 (0x219), region = 36  ;;  %v1503_v1 = vld [vmem:[%s1993_s1] sm:$0xff] (!%p207_p9)   ;;  %1317 = vmatprep.subr.bf16.mxu1 (!%p207_p9), %v1502_v0  ;;  %v1505_v3 = vld [vmem:[%s1993_s1 + $0x8] sm:$0xff] (!%p207_p9)   ;;  %p246_p10 = scmp.lt.s32.totalorder (!%p207_p9), %s1237_s7, 31  ;;  %v1507_v5 = vld [vmem:[%s1993_s1 + $0x10] sm:$0xff] (!%p207_p9)  }
   0xf   : > { %1318 = vmatpush3.bf16.msra.mxu1 (!%p207_p9), %v1503_v1  ;;  %v1508_v6 = vld [vmem:[%s1993_s1 + $0x58] sm:$0xff] (!%p207_p9)   ;;  %v1510_v8 = vld [vmem:[%s1993_s1 + $0x60] sm:$0xff] (!%p207_p9)   ;;  %v1512_v10 = vld [vmem:[%s1993_s1 + $0x68] sm:$0xff] (!%p207_p9)   ;;  %s1236_s14 = sshll.u32 (!%p207_p9), %s242_s13, 8  ;;  %s1316_s16 = sshll.u32 (!%p207_p9), %s1692_s22, 12 }
  0x10   : > { %1319 = vmatprep.subr.bf16.mxu1 (!%p207_p9), %v1504_v2  ;;  %v1509_v7 = vld [vmem:[%s1993_s1 + $0x18] sm:$0xff] (!%p207_p9)   ;;  %v1511_v9 = vld [vmem:[%s1993_s1 + $0x20] sm:$0xff] (!%p207_p9)   ;;  %v1513_v12 = vld [vmem:[%s1993_s1 + $0x28] sm:$0xff] (!%p207_p9)   ;;  %s1883_s15 = scalar_lea.vmem (!%p207_p9), [#allocation2], %s1236_s14  ;;  %s1928_s30 = scalar_lea.sflag (!%p207_p9), [#allocation3], %s242_s13 }
  0x11   : > { %v1514_v13 = vld [vmem:[%s1993_s1 + $0x70] sm:$0xff] (!%p207_p9)   ;;  %v1516_v15 = vld [vmem:[%s1993_s1 + $0x78] sm:$0xff] (!%p207_p9)   ;;  %v1542_v17 = vld [vmem:[%s1993_s1 + $0x40] sm:$0xff] (!%p207_p9)   ;;  %s1638_s22 = smov (!%p207_p9), [#allocation2]  }
  0x12   : > { %v1515_v14 = vld [vmem:[%s1993_s1 + $0x30] sm:$0xff] (!%p207_p9)   ;;  %v1517_v16 = vld [vmem:[%s1993_s1 + $0x38] sm:$0xff] (!%p207_p9)   ;;  %v1543_v18 = vld [vmem:[%s1993_s1] sm:$0xff] (!%p207_p9)   ;;  %1397 = vmatprep.subr.bf16.mxu0 (!%p207_p9), %v1542_v17  ;;  %s1578_s8 = sshll.u32 (!%p207_p9), %s1638_s22, 4  ;;  %s1579_s8 = int_to_ptr.vmem [resolvable:$false] %s1578_s8 }
  0x13   : > { %1320 = vmatpush3.bf16.msra.mxu1 (!%p207_p9), %v1505_v3  ;;  %v1544_v19 = vld [vmem:[%s1993_s1 + $0x48] sm:$0xff] (!%p207_p9)   ;;  %1398 = vmatpush3.bf16.xpose.msra.mxu0 (!%p207_p9), %v1543_v18  ;;  %v1546_v23 = vld [vmem:[%s1993_s1 + $0x50] sm:$0xff] (!%p207_p9)   ;;  %v1552_v24 = vld [vmem:[%s1995_s3] sm:$0xff] (!%p207_p9)   ;;  %s1580_s9 = scalar_lea.vmem (!%p207_p9), %s1579_s8, 8192 }
  0x14   : > { %1321 = vmatprep.subr.bf16.mxu1 (!%p207_p9), %v1506_v4  ;;  %1399 = vmatprep.subr.bf16.mxu0 (!%p207_p9), %v1544_v19  ;;  %v1545_v22 = vld [vmem:[%s1993_s1 + $0x8] sm:$0xff] (!%p207_p9)   ;;  %v1547_v28 = vld [vmem:[%s1993_s1 + $0x10] sm:$0xff] (!%p207_p9)   ;;  %v1548_v29 = vld [vmem:[%s1993_s1 + $0x58] sm:$0xff] (!%p207_p9)  }
  0x15   : > { %s2005_s7 = smov (!%p246_p10, %s1237_s7), 31  ;;  %v1555_v27 = vld [vmem:[%s1995_s3 + $0x8] sm:$0xff]   ;;  %v1558_v30 = vld [vmem:[%s1995_s3 + $0x10] sm:$0xff]   ;;  %v1559_v32 = vld [vmem:[%s1995_s3 + $0x18] sm:$0xff]  }
  0x16   : > { %s1314_s6 = sshll.u32 %s2005_s7, 3  ;;  %v1549_v34 = vld [vmem:[%s1993_s1 + $0x18] sm:$0xff]   ;;  %v1550_v35 = vld [vmem:[%s1993_s1 + $0x60] sm:$0xff]   ;;  %v1553_v39 = vld [vmem:[%s1993_s1 + $0x68] sm:$0xff]   ;;  %s1241_s17 = sshll.u32 %s2005_s7, 2 }
  0x17   : > { %1322 = vmatpush3.bf16.msra.mxu1 %v1507_v5  ;;  %s1755_s12 = scalar_lea.vmem %s1992_s0, %s1314_s6  ;;  %v1551_v38 = vld [vmem:[%s1993_s1 + $0x20] sm:$0xff]   ;;  %v1554_v42 = vld [vmem:[%s1993_s1 + $0x28] sm:$0xff]   ;;  %v1556_v43 = vld [vmem:[%s1993_s1 + $0x70] sm:$0xff]   ;;  %s1861_s26 = scalar_lea.vmem %s1994_s2, %s1241_s17 }
  0x18   : > { %1323 = vmatprep.subr.bf16.mxu1 %v1508_v6  ;;  %v1520_v11 = vld [vmem:[%s1755_s12 + $0x4] ss:$8 sps:$4 sm:$0xff]   ;;  %v1518_v20 = vld [vmem:[%s1755_s12] ss:$8 sps:$4 sm:$0xff]   ;;  %v1521_v21 = vld [vmem:[%s1755_s12 + $0x14] ss:$8 sps:$4 sm:$0xff]  }
  0x19   : > { %522 = vmatprep.mubr.bf16.mxu1 %v1520_v11  ;;  %v1523_v25 = vld [vmem:[%s1755_s12 + $0x10] ss:$8 sps:$4 sm:$0xff]   ;;  %v1524_v26 = vld [vmem:[%s1755_s12 + $0x24] ss:$8 sps:$4 sm:$0xff]   ;;  %v1526_v31 = vld [vmem:[%s1755_s12 + $0x20] ss:$8 sps:$4 sm:$0xff]  }
  0x1a   : > { %v1527_v33 = vld [vmem:[%s1755_s12 + $0x34] ss:$8 sps:$4 sm:$0xff]   ;;  %v1529_v36 = vld [vmem:[%s1755_s12 + $0x30] ss:$8 sps:$4 sm:$0xff]   ;;  %v1530_v37 = vld [vmem:[%s1755_s12 + $0x44] ss:$8 sps:$4 sm:$0xff]  }
  0x1b   : > { %1324 = vmatpush3.bf16.msra.mxu1 %v1509_v7  ;;  %1400 = vmatpush3.bf16.xpose.msra.mxu0 %v1545_v22  ;;  %v1532_v40 = vld [vmem:[%s1755_s12 + $0x40] ss:$8 sps:$4 sm:$0xff]   ;;  %v1533_v41 = vld [vmem:[%s1755_s12 + $0x54] ss:$8 sps:$4 sm:$0xff]   ;;  %v1535_v44 = vld [vmem:[%s1755_s12 + $0x50] ss:$8 sps:$4 sm:$0xff]  }
  0x1c   : > { %1325 = vmatprep.subr.bf16.mxu1 %v1510_v8  ;;  %1401 = vmatprep.subr.bf16.mxu0 %v1546_v23  ;;  %v1536_v45 = vld [vmem:[%s1755_s12 + $0x64] ss:$8 sps:$4 sm:$0xff]   ;;  %v1557_v46 = vld [vmem:[%s1993_s1 + $0x30] sm:$0xff]   ;;  %v1560_v47 = vld [vmem:[%s1993_s1 + $0x78] sm:$0xff]   ;;  %s1133_s17 = sshll.u32 %s1883_s15, 4  ;;  %s1924_s17 = int_to_ptr.vmem [resolvable:$true] %s1133_s17 }
  0x1d   : > { %v1538_v48 = vld [vmem:[%s1755_s12 + $0x60] ss:$8 sps:$4 sm:$0xff]   ;;  %v1539_v49 = vld [vmem:[%s1755_s12 + $0x74] ss:$8 sps:$4 sm:$0xff]   ;;  %v1541_v51 = vld [vmem:[%s1755_s12 + $0x70] ss:$8 sps:$4 sm:$0xff]   ;;  %p1581_p0 = scmp.lt.s32.totalorder %s1924_s17, %s1579_s8 }
  0x1e   : > { %v1561_v50 = vld [vmem:[%s1993_s1 + $0x38] sm:$0xff]   ;;  %v1562_v52 = vld [vmem:[%s1995_s3 + $0x20] sm:$0xff]   ;;  %v1564_v54 = vld [vmem:[%s1995_s3 + $0x28] sm:$0xff]   ;;  %s1574_s12 = scalar_lea.vmem %s1924_s17, 4096 }
  0x1f   : > { %1326 = vmatpush3.bf16.msra.mxu1 %v1511_v9  ;;  %v1563_v53 = vld [vmem:[%s1861_s26] sm:$0xff]   ;;  %v1565_v55 = vld [vmem:[%s1995_s3 + $0x30] sm:$0xff]   ;;  %v1566_v56 = vld [vmem:[%s1861_s26 + $0x8] sm:$0xff]   ;;  %p1575_p11 = scmp.ne.s32.totalorder %s1924_s17, %s1574_s12  ;;  %p1582_p1 = scmp.lt.s32.totalorder %s1580_s9, %s1574_s12 }
  0x20   : > { %1327 = vmatprep.subr.bf16.mxu1 %v1512_v10  ;;  %1413 = vmatprep.mubr.bf16.mxu0 %v1563_v53  ;;  %v1567_v57 = vld [vmem:[%s1995_s3 + $0x38] sm:$0xff]   ;;  %v1568_v58 = vld [vmem:[%s1861_s26 + $0x10] sm:$0xff]   ;;  %v1570_v60 = vld [vmem:[%s1861_s26 + $0x20] sm:$0xff]  }
  0x21   : > { %v1569_v59 = vld [vmem:[%s1861_s26 + $0x18] sm:$0xff]   ;;  %v1571_v61 = vld [vmem:[%s1861_s26 + $0x28] sm:$0xff]   ;;  %v1572_v62 = vld [vmem:[%s1861_s26 + $0x30] sm:$0xff]   ;;  %p1576_p12 = pnand %p1575_p11, %p1709_p5  ;;  %p1583_p2 = por %p1582_p1, %p1581_p0 }
  0x22   : > { %v1573_v63 = vld [vmem:[%s1861_s26 + $0x38] sm:$0xff]   ;;  %s1922_s26 = scalar_lea.hbm %s1997_s5, %s1316_s16 }
  0x23   : > { %1328 = vmatpush3.bf16.msra.mxu1 %v1513_v12  ;;  %1402 = vmatpush3.bf16.xpose.msra.mxu0 %v1547_v28  ;;  %p1577_p13 = pneg %p1576_p12 }
  0x24   : > { %1329 = vmatprep.subr.bf16.mxu1 %v1514_v13  ;;  %1403 = vmatprep.subr.bf16.mxu0 %v1548_v29 }
  0x25   : > { %p1584_p3 = pnand %p1583_p2, %p1577_p13 }
  0x27   : > { %1330 = vmatpush3.bf16.msra.mxu1 %v1515_v14 }
  0x28   : > { %1331 = vmatprep.subr.bf16.mxu1 %v1516_v15 }
  0x2b   : > { %1332 = vmatpush3.bf16.msra.mxu1 %v1517_v16  ;;  %1404 = vmatpush3.bf16.xpose.msra.mxu0 %v1549_v34 }
  0x2c   : > { %1429 = vmatprep.subr.bf16.mxu1 %v1552_v24  ;;  %1405 = vmatprep.subr.bf16.mxu0 %v1550_v35 }
  0x2e   : > { %523 = vmatmul.mubr.bf16.vlgmr.msra.gmra.mrb[0].mxu1 %v1518_v20 }
  0x2f   : > { %530 = vmatprep.mubr.bf16.mxu1 %v1521_v21  ;;  %1430 = vmatpush3.bf16.msra.mxu1 %v1552_v24 }
  0x30   : > { %1431 = vmatprep.subr.bf16.mxu1 %v1555_v27 }
  0x33   : > { %1432 = vmatpush3.bf16.msra.mxu1 %v1555_v27  ;;  %1406 = vmatpush3.bf16.xpose.msra.mxu0 %v1551_v38 }
  0x34   : > { %1433 = vmatprep.subr.bf16.mxu1 %v1558_v30  ;;  %1407 = vmatprep.subr.bf16.mxu0 %v1553_v39 }
  0x36   : > { %531 = vmatmul.mubr.bf16.gmra.mrb[4].mxu1 %v1523_v25 }
  0x37   : > { %538 = vmatprep.mubr.bf16.mxu1 %v1524_v26  ;;  %1434 = vmatpush3.bf16.msra.mxu1 %v1558_v30 }
  0x38   : > { %1435 = vmatprep.subr.bf16.mxu1 %v1559_v32 }
  0x3b   : > { %1436 = vmatpush3.bf16.msra.mxu1 %v1559_v32  ;;  %1408 = vmatpush3.bf16.xpose.msra.mxu0 %v1554_v42 }
  0x3c   : > { %1409 = vmatprep.subr.bf16.mxu0 %v1556_v43  ;;  %1437 = vmatprep.subr.bf16.mxu1 %v1562_v52 }
  0x3e   : > { %539 = vmatmul.mubr.bf16.gmra.mrb[8].mxu1 %v1526_v31 }
  0x3f   : > { %546 = vmatprep.mubr.bf16.mxu1 %v1527_v33  ;;  %1438 = vmatpush3.bf16.msra.mxu1 %v1562_v52 }
  0x40   : > { %1439 = vmatprep.subr.bf16.mxu1 %v1564_v54 }
  0x43   : > { %1410 = vmatpush3.bf16.xpose.msra.mxu0 %v1557_v46  ;;  %1440 = vmatpush3.bf16.msra.mxu1 %v1564_v54 }
  0x44   : > { %1411 = vmatprep.subr.bf16.mxu0 %v1560_v47  ;;  %1441 = vmatprep.subr.bf16.mxu1 %v1565_v55 }
  0x46   : > { %547 = vmatmul.mubr.bf16.gmra.mrb[12].mxu1 %v1529_v36 }
  0x47   : > { %554 = vmatprep.mubr.bf16.mxu1 %v1530_v37  ;;  %1442 = vmatpush3.bf16.msra.mxu1 %v1565_v55 }
  0x48   : > { %1443 = vmatprep.subr.bf16.mxu1 %v1567_v57 }
  0x4b   : > { %1412 = vmatpush3.bf16.xpose.msra.mxu0 %v1561_v50  ;;  %1444 = vmatpush3.bf16.msra.mxu1 %v1567_v57 }
  0x4e   : > { %555 = vmatmul.mubr.bf16.gmra.mrb[16].mxu1 %v1532_v40 }
  0x4f   : > { %562 = vmatprep.mubr.bf16.mxu1 %v1533_v41 }
  0x52   : > { %1414 = vmatmul.mubr.bf16.vlgmr.msra.gmra.mrb[0].mxu0 %v1563_v53 }
  0x53   : > { %1415 = vmatprep.mubr.bf16.mxu0 %v1566_v56 }
  0x56   : > { %563 = vmatmul.mubr.bf16.gmra.mrb[20].mxu1 %v1535_v44 }
  0x57   : > { %570 = vmatprep.mubr.bf16.mxu1 %v1536_v45 }
  0x5a   : > { %1416 = vmatmul.mubr.bf16.gmra.mrb[4].mxu0 %v1566_v56 }
  0x5b   : > { %1417 = vmatprep.mubr.bf16.mxu0 %v1568_v58 }
  0x5e   : > { %571 = vmatmul.mubr.bf16.gmra.mrb[24].mxu1 %v1538_v48 }
  0x5f   : > { %578 = vmatprep.mubr.bf16.mxu1 %v1539_v49 }
  0x62   : > { %1418 = vmatmul.mubr.bf16.gmra.mrb[8].mxu0 %v1568_v58 }
  0x63   : > { %1419 = vmatprep.mubr.bf16.mxu0 %v1569_v59 }
  0x66   : > { %579 = vmatmul.mubr.bf16.gmra.mrb[28].mxu1 %v1541_v51 }
  0x6a   : > { %1420 = vmatmul.mubr.bf16.gmra.mrb[12].mxu0 %v1569_v59 }
  0x6b   : > { %1421 = vmatprep.mubr.bf16.mxu0 %v1570_v60 }
  0x72   : > { %1422 = vmatmul.mubr.bf16.gmra.mrb[16].mxu0 %v1570_v60 }
  0x73   : > { %1423 = vmatprep.mubr.bf16.mxu0 %v1571_v61 }
  0x7a   : > { %1424 = vmatmul.mubr.bf16.gmra.mrb[20].mxu0 %v1571_v61 }
  0x7b   : > { %1425 = vmatprep.mubr.bf16.mxu0 %v1572_v62 }
  0x82   : > { %1426 = vmatmul.mubr.bf16.gmra.mrb[24].mxu0 %v1572_v62 }
  0x83   : > { %1427 = vmatprep.mubr.bf16.mxu0 %v1573_v63 }
  0x8a   : > { %1428 = vmatmul.mubr.bf16.gmra.mrb[28].mxu0 %v1573_v63 }
 0x101   : > { %v1333_v0 = vpop.f32.mrb[0].mxu1 }
 0x102   : > { %v1334_v1 = vpop.f32.mrb[1].mxu1 }
 0x103   : > { %v1335_v2 = vadd.f32 %v1334_v1, %v1333_v0  ;;  %v1336_v3 = vpop.f32.mrb[2].mxu1 }
 0x104   : > { %v1337_v4 = vpop.f32.mrb[3].mxu1 }
 0x105   : > { %v1338_v5 = vadd.f32 %v1337_v4, %v1336_v3 }
 0x107   : > { %v587_v6 = vpack.c.bf16 %v1338_v5, %v1335_v2 }
 0x109   : > { %v1339_v7 = vpop.f32.mrb[4].mxu1  ;;  %1445 = vmatprep.mubr.bf16.mxu1 %v587_v6 }
 0x10a   : > { %v1340_v8 = vpop.f32.mrb[5].mxu1 }
 0x10b   : > { %v1341_v9 = vadd.f32 %v1340_v8, %v1339_v7  ;;  %v1342_v10 = vpop.f32.mrb[6].mxu1 }
 0x10c   : > { %v1343_v11 = vpop.f32.mrb[7].mxu1 }
 0x10d   : > { %v1344_v12 = vadd.f32 %v1343_v11, %v1342_v10 }
 0x10f   : > { %v588_v13 = vpack.c.bf16 %v1344_v12, %v1341_v9 }
 0x111   : > { %v1345_v14 = vpop.f32.mrb[8].mxu1  ;;  %1446 = vmatmul.mubr.bf16.vlgmr.msra.gmra.mrb[32].mxu1 %v588_v13 }
 0x112   : > { %v1346_v15 = vpop.f32.mrb[9].mxu1 }
 0x113   : > { %v1347_v16 = vadd.f32 %v1346_v15, %v1345_v14  ;;  %v1348_v17 = vpop.f32.mrb[10].mxu1 }
 0x114   : > { %v1349_v18 = vpop.f32.mrb[11].mxu1 }
 0x115   : > { %v1350_v19 = vadd.f32 %v1349_v18, %v1348_v17 }
 0x117   : > { %v589_v20 = vpack.c.bf16 %v1350_v19, %v1347_v16 }
 0x119   : > { %v1351_v21 = vpop.f32.mrb[12].mxu1  ;;  %1449 = vmatprep.mubr.bf16.mxu1 %v589_v20 }
 0x11a   : > { %v1352_v22 = vpop.f32.mrb[13].mxu1 }
 0x11b   : > { %v1353_v23 = vadd.f32 %v1352_v22, %v1351_v21  ;;  %v1354_v24 = vpop.f32.mrb[14].mxu1 }
 0x11c   : > { %v1355_v25 = vpop.f32.mrb[15].mxu1 }
 0x11d   : > { %v1356_v26 = vadd.f32 %v1355_v25, %v1354_v24 }
 0x11f   : > { %v590_v27 = vpack.c.bf16 %v1356_v26, %v1353_v23 }
 0x121   : > { %v1357_v28 = vpop.f32.mrb[16].mxu1  ;;  %1450 = vmatmul.mubr.bf16.gmra.mrb[36].mxu1 %v590_v27 }
 0x122   : > { %v1358_v29 = vpop.f32.mrb[17].mxu1 }
 0x123   : > { %v1359_v30 = vadd.f32 %v1358_v29, %v1357_v28  ;;  %v1360_v31 = vpop.f32.mrb[18].mxu1 }
 0x124   : > { %v1361_v32 = vpop.f32.mrb[19].mxu1 }
 0x125   : > { %v1362_v33 = vadd.f32 %v1361_v32, %v1360_v31  ;;  %v998_v56 = vpop.f32.mrb[0].mxu0 }
 0x126   : > { %1077 = vst [vmem:[%s1883_s15] sm:$0xff] %v998_v56  ;;  %v1000_v57 = vpop.f32.mrb[1].mxu0 }
 0x127   : > { %v591_v34 = vpack.c.bf16 %v1362_v33, %v1359_v30  ;;  %1078 = vst [vmem:[%s1883_s15 + $0x8] sm:$0xff] %v1000_v57  ;;  %v1002_v58 = vpop.f32.mrb[2].mxu0 }
 0x128   : > { %1079 = vst [vmem:[%s1883_s15 + $0x10] sm:$0xff] %v1002_v58  ;;  %v1004_v59 = vpop.f32.mrb[3].mxu0 }
 0x129   : > { %v1363_v35 = vpop.f32.mrb[20].mxu1  ;;  %1453 = vmatprep.mubr.bf16.mxu1 %v591_v34  ;;  %1080 = vst [vmem:[%s1883_s15 + $0x18] sm:$0xff] %v1004_v59 }
 0x12a   : > { %v1364_v36 = vpop.f32.mrb[21].mxu1 }
 0x12b   : > { %v1365_v37 = vadd.f32 %v1364_v36, %v1363_v35  ;;  %v1366_v38 = vpop.f32.mrb[22].mxu1 }
 0x12c   : > { %v1367_v39 = vpop.f32.mrb[23].mxu1 }
 0x12d   : > { %v1368_v40 = vadd.f32 %v1367_v39, %v1366_v38  ;;  %v1008_v60 = vpop.f32.mrb[4].mxu0 }
 0x12e   : > { %1081 = vst [vmem:[%s1883_s15 + $0x20] sm:$0xff] %v1008_v60  ;;  %v1010_v61 = vpop.f32.mrb[5].mxu0 }
 0x12f   : > { %v592_v41 = vpack.c.bf16 %v1368_v40, %v1365_v37  ;;  %1082 = vst [vmem:[%s1883_s15 + $0x28] sm:$0xff] %v1010_v61  ;;  %v1012_v62 = vpop.f32.mrb[6].mxu0 }
 0x130   : > { %1083 = vst [vmem:[%s1883_s15 + $0x30] sm:$0xff] %v1012_v62  ;;  %v1014_v63 = vpop.f32.mrb[7].mxu0 }
 0x131   : > { %v1369_v42 = vpop.f32.mrb[24].mxu1  ;;  %1454 = vmatmul.mubr.bf16.gmra.mrb[40].mxu1 %v592_v41  ;;  %1084 = vst [vmem:[%s1883_s15 + $0x38] sm:$0xff] %v1014_v63 }
 0x132   : > { %v1370_v43 = vpop.f32.mrb[25].mxu1 }
 0x133   : > { %v1371_v44 = vadd.f32 %v1370_v43, %v1369_v42  ;;  %v1372_v45 = vpop.f32.mrb[26].mxu1 }
 0x134   : > { %v1373_v46 = vpop.f32.mrb[27].mxu1 }
 0x135   : > { %v1374_v47 = vadd.f32 %v1373_v46, %v1372_v45  ;;  %v1018_v0 = vpop.f32.mrb[8].mxu0 }
 0x136   : > { %1085 = vst [vmem:[%s1883_s15 + $0x40] sm:$0xff] %v1018_v0  ;;  %v1020_v1 = vpop.f32.mrb[9].mxu0 }
 0x137   : > { %v593_v48 = vpack.c.bf16 %v1374_v47, %v1371_v44  ;;  %1086 = vst [vmem:[%s1883_s15 + $0x48] sm:$0xff] %v1020_v1  ;;  %v1022_v2 = vpop.f32.mrb[10].mxu0 }
 0x138   : > { %1087 = vst [vmem:[%s1883_s15 + $0x50] sm:$0xff] %v1022_v2  ;;  %v1024_v3 = vpop.f32.mrb[11].mxu0 }
 0x139   : > { %v1375_v49 = vpop.f32.mrb[28].mxu1  ;;  %1457 = vmatprep.mubr.bf16.mxu1 %v593_v48  ;;  %1088 = vst [vmem:[%s1883_s15 + $0x58] sm:$0xff] %v1024_v3 }
 0x13a   : > { %v1376_v50 = vpop.f32.mrb[29].mxu1 }
 0x13b   : > { %v1377_v51 = vadd.f32 %v1376_v50, %v1375_v49  ;;  %v1378_v52 = vpop.f32.mrb[30].mxu1 }
 0x13c   : > { %v1379_v53 = vpop.f32.mrb[31].mxu1 }
 0x13d   : > { %v1380_v54 = vadd.f32 %v1379_v53, %v1378_v52  ;;  %v1028_v4 = vpop.f32.mrb[12].mxu0 }
 0x13e   : > { %1089 = vst [vmem:[%s1883_s15 + $0x60] sm:$0xff] %v1028_v4  ;;  %v1030_v5 = vpop.f32.mrb[13].mxu0 }
 0x13f   : > { %v594_v55 = vpack.c.bf16 %v1380_v54, %v1377_v51  ;;  %1090 = vst [vmem:[%s1883_s15 + $0x68] sm:$0xff] %v1030_v5  ;;  %v1032_v6 = vpop.f32.mrb[14].mxu0 }
 0x140   : > { %1091 = vst [vmem:[%s1883_s15 + $0x70] sm:$0xff] %v1032_v6  ;;  %v1034_v7 = vpop.f32.mrb[15].mxu0 }
 0x141   : > { %1458 = vmatmul.mubr.bf16.gmra.mrb[44].mxu1 %v594_v55  ;;  %1092 = vst [vmem:[%s1883_s15 + $0x78] sm:$0xff] %v1034_v7 }
 0x145   : > { %v1038_v8 = vpop.f32.mrb[16].mxu0 }
 0x146   : > { %1093 = vst [vmem:[%s1883_s15 + $0x80] sm:$0xff] %v1038_v8  ;;  %v1040_v9 = vpop.f32.mrb[17].mxu0 }
 0x147   : > { %1094 = vst [vmem:[%s1883_s15 + $0x88] sm:$0xff] %v1040_v9  ;;  %v1042_v10 = vpop.f32.mrb[18].mxu0 }
 0x148   : > { %1095 = vst [vmem:[%s1883_s15 + $0x90] sm:$0xff] %v1042_v10  ;;  %v1044_v11 = vpop.f32.mrb[19].mxu0 }
 0x149   : > { %1096 = vst [vmem:[%s1883_s15 + $0x98] sm:$0xff] %v1044_v11 }
 0x14d   : > { %v1048_v12 = vpop.f32.mrb[20].mxu0 }
 0x14e   : > { %1097 = vst [vmem:[%s1883_s15 + $0xa0] sm:$0xff] %v1048_v12  ;;  %v1050_v13 = vpop.f32.mrb[21].mxu0 }
 0x14f   : > { %1098 = vst [vmem:[%s1883_s15 + $0xa8] sm:$0xff] %v1050_v13  ;;  %v1052_v14 = vpop.f32.mrb[22].mxu0 }
 0x150   : > { %1099 = vst [vmem:[%s1883_s15 + $0xb0] sm:$0xff] %v1052_v14  ;;  %v1054_v15 = vpop.f32.mrb[23].mxu0 }
 0x151   : > { %1100 = vst [vmem:[%s1883_s15 + $0xb8] sm:$0xff] %v1054_v15 }
 0x155   : > { %v1058_v16 = vpop.f32.mrb[24].mxu0 }
 0x156   : > { %1101 = vst [vmem:[%s1883_s15 + $0xc0] sm:$0xff] %v1058_v16  ;;  %v1060_v17 = vpop.f32.mrb[25].mxu0 }
 0x157   : > { %1102 = vst [vmem:[%s1883_s15 + $0xc8] sm:$0xff] %v1060_v17  ;;  %v1062_v18 = vpop.f32.mrb[26].mxu0 }
 0x158   : > { %1103 = vst [vmem:[%s1883_s15 + $0xd0] sm:$0xff] %v1062_v18  ;;  %v1064_v19 = vpop.f32.mrb[27].mxu0 }
 0x159   : > { %1104 = vst [vmem:[%s1883_s15 + $0xd8] sm:$0xff] %v1064_v19 }
 0x15d   : > { %v1068_v20 = vpop.f32.mrb[28].mxu0 }
 0x15e   : > { %1105 = vst [vmem:[%s1883_s15 + $0xe0] sm:$0xff] %v1068_v20  ;;  %v1070_v21 = vpop.f32.mrb[29].mxu0 }
 0x15f   : > { %1106 = vst [vmem:[%s1883_s15 + $0xe8] sm:$0xff] %v1070_v21  ;;  %v1072_v22 = vpop.f32.mrb[30].mxu0 }
 0x160   : > { %1107 = vst [vmem:[%s1883_s15 + $0xf0] sm:$0xff] %v1072_v22  ;;  %v1074_v23 = vpop.f32.mrb[31].mxu0 }
 0x161   : > { %1108 = vst [vmem:[%s1883_s15 + $0xf8] sm:$0xff] %v1074_v23 }
 0x162   : > { %1587 = shalt.err (!%p1584_p3)
}
 0x163   : > { %s1588_s10 = scalar_lea.hbm %s1922_s26, 4096  ;;  %s1592_s14 = scalar_lea.hbm %s1997_s5, 8192 }
 0x164   : > { %p1589_p4 = scmp.ne.s32.totalorder %s1922_s26, %s1588_s10  ;;  %p1593_p9 = scmp.lt.u32.totalorder %s1922_s26, %s1997_s5 }
 0x165   : > { %p1594_p10 = scmp.lt.u32.totalorder %s1592_s14, %s1588_s10  ;;  %p1596_p12 = scmp.lt.u32.totalorder %s1588_s10, %s1922_s26 }
 0x166   : > { %p1590_p7 = pnand %p1589_p4, %p1709_p5 }
 0x167   : > { %p1595_p11 = por %p1594_p10, %p1593_p9 }
 0x168   : > { %p1591_p8 = pneg %p1590_p7 }
 0x169   : > { %p1597_p13 = por %p1596_p12, %p1595_p11 }
 0x16b   : > { %p1598_p0 = pnand %p1597_p13, %p1591_p8 }
 0x16d   : > { %1601 = shalt.err (!%p1598_p0)
}
 0x16e   : > { %s1639_s23 = smov 256   ;;  %s1640_s25 = smov 16  }
 0x16f   : > { %1461 = dma.vmem_to_hbm [thread:$0]  (%p1709_p5), %s1924_s17, 4096, %s1922_s26, %s1928_s30, %s1639_s23, %s1639_s23, %s1640_s25  }
 0x170   : > { %s1957_s8 = scalar_lea.vmem %s1996_s4, %s1314_s6 }
 0x1e4   : > { %v1447_v24 = vpop.f32.mrb[32].mxu1 }
 0x1e5   : > { %758 = vst [vmem:[%s1957_s8 + $0x10] sm:$0xff] %v1447_v24  ;;  %v693_v25 = vpop.f32.mrb[33].mxu1 }
 0x1e6   : > { %756 = vst [vmem:[%s1957_s8] sm:$0xff] %v693_v25  ;;  %v1448_v26 = vpop.f32.mrb[34].mxu1 }
 0x1e7   : > { %759 = vst [vmem:[%s1957_s8 + $0x18] sm:$0xff] %v1448_v26  ;;  %v696_v27 = vpop.f32.mrb[35].mxu1 }
 0x1e8   : > { %757 = vst [vmem:[%s1957_s8 + $0x8] sm:$0xff] %v696_v27 }
 0x1f4   : > { %v1451_v28 = vpop.f32.mrb[36].mxu1 }
 0x1f5   : > { %762 = vst [vmem:[%s1957_s8 + $0x30] sm:$0xff] %v1451_v28  ;;  %v709_v29 = vpop.f32.mrb[37].mxu1 }
 0x1f6   : > { %760 = vst [vmem:[%s1957_s8 + $0x20] sm:$0xff] %v709_v29  ;;  %v1452_v30 = vpop.f32.mrb[38].mxu1 }
 0x1f7   : > { %763 = vst [vmem:[%s1957_s8 + $0x38] sm:$0xff] %v1452_v30  ;;  %v712_v31 = vpop.f32.mrb[39].mxu1 }
 0x1f8   : > { %761 = vst [vmem:[%s1957_s8 + $0x28] sm:$0xff] %v712_v31 }
 0x204   : > { %v1455_v32 = vpop.f32.mrb[40].mxu1 }
 0x205   : > { %766 = vst [vmem:[%s1957_s8 + $0x50] sm:$0xff] %v1455_v32  ;;  %v725_v33 = vpop.f32.mrb[41].mxu1 }
 0x206   : > { %764 = vst [vmem:[%s1957_s8 + $0x40] sm:$0xff] %v725_v33  ;;  %v1456_v34 = vpop.f32.mrb[42].mxu1 }
 0x207   : > { %767 = vst [vmem:[%s1957_s8 + $0x58] sm:$0xff] %v1456_v34  ;;  %v728_v35 = vpop.f32.mrb[43].mxu1 }
 0x208   : > { %765 = vst [vmem:[%s1957_s8 + $0x48] sm:$0xff] %v728_v35 }
 0x214   : > { %v1459_v36 = vpop.f32.mrb[44].mxu1 }
 0x215   : > { %770 = vst [vmem:[%s1957_s8 + $0x70] sm:$0xff] %v1459_v36  ;;  %v741_v37 = vpop.f32.mrb[45].mxu1 }
 0x216   : > { %768 = vst [vmem:[%s1957_s8 + $0x60] sm:$0xff] %v741_v37  ;;  %v1460_v38 = vpop.f32.mrb[46].mxu1 }
 0x217   : > { %771 = vst [vmem:[%s1957_s8 + $0x78] sm:$0xff] %v1460_v38  ;;  %v744_v39 = vpop.f32.mrb[47].mxu1 }
 0x218   : > { %769 = vst [vmem:[%s1957_s8 + $0x68] sm:$0xff] %v744_v39 }
 0x219 PF: > { %p1467_p5 = scmp.ge.s32.totalorder %s1636_s21, 2  ;;  %s1156_s28 = sand.u32 1, %s1624_s18  }
 0x21a   : > { %s1157_s7 = scalar_lea.sflag [#allocation3], %s1156_s28 }
 0x21b   : > { %p1464_p1 = pnand %p1467_p5, %p1713_p6 }
 0x21d   : > { %1619 = dma.done.wait (!%p1464_p1), %s1157_s7, 4096  }
 0x21e   : > { %1621 = vsyncadd (!%p1464_p1), %s1157_s7, 4294963200  ;;  %p16_p2 = scmp.ge.s32.totalorder %s1696_s24, 4   ;;  %s2000_s18 = smov %s1628_s19 }
 0x21f   : > { %s2001_s19 = smov %s1632_s20  ;;  %s2002_s20 = smov %s1707_s27 }
 0x220   : > { %s2003_s21 = smov %s1696_s24  ;;  %18 = sbr.rel (!%p16_p2) target bundleno = 3 (0x3), region = 86 }
 0x227   :  { %1162 = vsyncpa [#allocation3], 1 }
 0x228   :  { %1164 = vsyncpa [#allocation3 + $0x1], 1 }

</bundles_post_ra>
